<compile_context>
chip_gen: v7x
topology: tpu7x:2x2x1
jax: 0.10.0
libtpu: 0.0.40
codegen_flags: <defaults>
</compile_context>

<pallas_src>
import math

import jax
import jax.numpy as jnp
from jax import lax
from jax.experimental import pallas as pl
from jax.experimental.pallas import tpu as pltpu

HIDDEN_SIZE = 128
INPUT_SIZE = 2
OUTPUT_SIZE = 1
LAYERS = 1            # single-layer LSTM, matches the module
OUT_PAD = 128         # lane-dense padded output width


def lstm_kernel(x_ref, w_ih_ref, w_hh_ref, b_ref, w_out_ref, b_out_ref,
                h0_ref, c0_ref,
                out_ref, hn_ref, cn_ref,
                xg_ref, hs_ref):
    """Single-layer LSTM recurrence + tanh + padded output projection, in VMEM.

    x_ref     : (T, INPUT_SIZE)        f32
    w_ih_ref  : (INPUT_SIZE, 4*H)      f32   (transposed torch weight_ih_l0)
    w_hh_ref  : (H, 4*H)               f32   (transposed torch weight_hh_l0)
    b_ref     : (1, 4*H)               f32   (b_ih + b_hh)
    w_out_ref : (H, OUT_PAD)           f32   (transposed torch out.weight, zero-padded)
    b_out_ref : (1, OUT_PAD)           f32   (zero-padded)
    h0_ref/c0_ref : (1, H)             f32
    out_ref   : (T, OUT_PAD)           f32   (column 0 is the real output)
    hn_ref/cn_ref : (1, H)             f32
    xg_ref    : VMEM scratch (T, 4*H)  f32
    hs_ref    : VMEM scratch (T, H)    f32   (holds tanh(h_t))
    """
    H = HIDDEN_SIZE
    T = x_ref.shape[0]

    # Input contribution for every timestep in one MXU pass, bias folded once.
    xg_ref[...] = (jnp.dot(x_ref[...], w_ih_ref[...],
                           preferred_element_type=jnp.float32)
                   + b_ref[...])

    w_hh = w_hh_ref[...]

    def step(t, carry):
        h, c = carry                                           # each (1, H)
        gates = xg_ref[pl.ds(t, 1), :] + jnp.dot(
            h, w_hh, preferred_element_type=jnp.float32)       # (1, 4H)
        # PyTorch gate order: i, f, g, o.  Fuse i/f sigmoid into one EUP pass.
        if_g = jax.nn.sigmoid(gates[:, 0:2 * H])
        i_g = if_g[:, 0:H]
        f_g = if_g[:, H:2 * H]
        g_g = jnp.tanh(gates[:, 2 * H:3 * H])
        o_g = jax.nn.sigmoid(gates[:, 3 * H:4 * H])
        c = f_g * c + i_g * g_g
        h = o_g * jnp.tanh(c)
        # Store tanh(h_t) directly so the epilogue is a single matmul;
        # a plain row store, no live concat / XLU shuffle.
        hs_ref[pl.ds(t, 1), :] = jnp.tanh(h)
        return h, c

    h, c = lax.fori_loop(0, T, step, (h0_ref[...], c0_ref[...]),
                         unroll=min(T, 8))

    # outputs = Linear(tanh(outputs)) — lane-dense (T, 128) store.
    out_ref[...] = (jnp.dot(hs_ref[...], w_out_ref[...],
                            preferred_element_type=jnp.float32)
                    + b_out_ref[...]).astype(out_ref.dtype)
    hn_ref[...] = h
    cn_ref[...] = c


def init_params(key):
    """Deterministic parameter init mirroring the torch __init__ shapes/inits."""
    k1, k2, k3 = jax.random.split(key, 3)

    def xavier_normal(k, shape):
        fan_out, fan_in = shape
        std = math.sqrt(2.0 / (fan_in + fan_out))
        return std * jax.random.normal(k, shape, dtype=jnp.float32)

    # torch layouts
    w_ih = xavier_normal(k1, (4 * HIDDEN_SIZE, INPUT_SIZE))    # weight_ih_l0
    w_hh = xavier_normal(k2, (4 * HIDDEN_SIZE, HIDDEN_SIZE))   # weight_hh_l0
    b_ih = jnp.zeros((4 * HIDDEN_SIZE,), jnp.float32)          # bias_ih_l0
    b_hh = jnp.zeros((4 * HIDDEN_SIZE,), jnp.float32)          # bias_hh_l0
    w_out = xavier_normal(k3, (OUTPUT_SIZE, HIDDEN_SIZE))      # out.weight
    b_out = jnp.zeros((OUTPUT_SIZE,), jnp.float32)             # out.bias
    return dict(w_ih=w_ih, w_hh=w_hh, b_ih=b_ih, b_hh=b_hh,
                w_out=w_out, b_out=b_out)


def lstm_forward(x, params, h0=None, c0=None):
    """x: (T, 1, INPUT_SIZE) f32 -> ((T*1, OUTPUT_SIZE), h_n, c_n)."""
    T, B, _ = x.shape
    assert B == 1, "module's hidden state has batch=1"
    x2d = x.reshape(T, INPUT_SIZE).astype(jnp.float32)

    if h0 is None:
        h0 = jnp.zeros((1, HIDDEN_SIZE), jnp.float32)
    if c0 is None:
        c0 = jnp.zeros((1, HIDDEN_SIZE), jnp.float32)

    # Kernel-friendly (transposed / padded) layouts.
    w_ih_t = params["w_ih"].T                                   # (INPUT, 4H)
    w_hh_t = params["w_hh"].T                                   # (H, 4H)
    bias = (params["b_ih"] + params["b_hh"]).reshape(1, -1)     # (1, 4H)
    # Lane-dense projection: pad (H, 1) -> (H, 128) and slice col 0 afterwards.
    w_out_pad = jnp.zeros((HIDDEN_SIZE, OUT_PAD), jnp.float32)
    w_out_pad = w_out_pad.at[:, :OUTPUT_SIZE].set(params["w_out"].T)
    b_out_pad = jnp.zeros((1, OUT_PAD), jnp.float32)
    b_out_pad = b_out_pad.at[:, :OUTPUT_SIZE].set(params["b_out"].reshape(1, -1))

    vmem = pl.BlockSpec(memory_space=pltpu.MemorySpace.VMEM)
    out_pad, h_n, c_n = pl.pallas_call(
        lstm_kernel,
        out_shape=(
            jax.ShapeDtypeStruct((T, OUT_PAD), jnp.float32),
            jax.ShapeDtypeStruct((1, HIDDEN_SIZE), jnp.float32),
            jax.ShapeDtypeStruct((1, HIDDEN_SIZE), jnp.float32),
        ),
        in_specs=[vmem] * 8,
        out_specs=(vmem, vmem, vmem),
        scratch_shapes=[
            pltpu.VMEM((T, 4 * HIDDEN_SIZE), jnp.float32),  # xg scratch
            pltpu.VMEM((T, HIDDEN_SIZE), jnp.float32),      # tanh(h_t) rows
        ],
    )(x2d, w_ih_t, w_hh_t, bias, w_out_pad, b_out_pad, h0, c0)

    out = out_pad[:, :OUTPUT_SIZE]          # (T*1, OUTPUT_SIZE)
    return out, h_n, c_n


def lstm_reference(x, params, h0, c0):
    """Pure-JAX reference of the torch forward (for correctness check)."""
    T = x.shape[0]
    H = HIDDEN_SIZE
    h, c = h0, c0
    hs = []
    for t in range(T):
        g = (x[t].reshape(1, INPUT_SIZE) @ params["w_ih"].T
             + h @ params["w_hh"].T
             + params["b_ih"] + params["b_hh"])
        i = jax.nn.sigmoid(g[:, 0 * H:1 * H])
        f = jax.nn.sigmoid(g[:, 1 * H:2 * H])
        gg = jnp.tanh(g[:, 2 * H:3 * H])
        o = jax.nn.sigmoid(g[:, 3 * H:4 * H])
        c = f * c + i * gg
        h = o * jnp.tanh(c)
        hs.append(h)
    hs = jnp.concatenate(hs, axis=0)
    out = jnp.tanh(hs) @ params["w_out"].T + params["b_out"]
    return out.reshape(T, OUTPUT_SIZE)


if __name__ == "__main__":
    key = jax.random.PRNGKey(0)
    pkey, xkey = jax.random.split(key)

    params = init_params(pkey)

    seq_len = 8
    x = jax.random.normal(xkey, (seq_len, 1, INPUT_SIZE), dtype=jnp.float32)

    h0 = jnp.zeros((1, HIDDEN_SIZE), jnp.float32)
    c0 = jnp.zeros((1, HIDDEN_SIZE), jnp.float32)

    out, h_n, c_n = lstm_forward(x, params, h0, c0)
    jax.block_until_ready((out, h_n, c_n))

    ref = lstm_reference(x, params, h0, c0)
    ref_hn, ref_cn = None, None
    assert out.shape == (seq_len * 1, OUTPUT_SIZE)
    assert jnp.allclose(out, ref, atol=1e-5, rtol=1e-5), "mismatch vs reference"

    print("KERNEL_OK")
</pallas_src>

<mosaic_0001>
module attributes {stable_mosaic.version = 11 : i64} {
  func.func @lstm_kernel(%arg0: memref<8x2xf32, #tpu.memory_space<vmem>>, %arg1: memref<2x512xf32, #tpu.memory_space<vmem>>, %arg2: memref<128x512xf32, #tpu.memory_space<vmem>>, %arg3: memref<1x512xf32, #tpu.memory_space<vmem>>, %arg4: memref<128x128xf32, #tpu.memory_space<vmem>>, %arg5: memref<1x128xf32, #tpu.memory_space<vmem>>, %arg6: memref<1x128xf32, #tpu.memory_space<vmem>>, %arg7: memref<1x128xf32, #tpu.memory_space<vmem>>, %arg8: memref<8x128xf32, #tpu.memory_space<vmem>>, %arg9: memref<1x128xf32, #tpu.memory_space<vmem>>, %arg10: memref<1x128xf32, #tpu.memory_space<vmem>>, %arg11: memref<8x512xf32, #tpu.memory_space<vmem>>, %arg12: memref<8x128xf32, #tpu.memory_space<vmem>>) attributes {dimension_semantics = [], scalar_prefetch = 0 : i64, scratch_operands = 2 : i64, tpu.core_type = #tpu.core_type<tc>} {
    %c0 = arith.constant 0 : index
    %c0_0 = arith.constant 0 : index
    %0 = vector.load %arg0[%c0, %c0_0] : memref<8x2xf32, #tpu.memory_space<vmem>>, vector<8x2xf32>
    %c0_1 = arith.constant 0 : index
    %c0_2 = arith.constant 0 : index
    %1 = vector.load %arg1[%c0_1, %c0_2] : memref<2x512xf32, #tpu.memory_space<vmem>>, vector<2x512xf32>
    %cst = arith.constant dense<0.000000e+00> : vector<8x512xf32>
    %2 = tpu.matmul %0, %1, %cst {dimension_numbers = #tpu.dot_dimension_numbers<[1], [0], [0], [1], [0, 0, 1, 1], [], []>} : vector<8x2xf32>, vector<2x512xf32>, vector<8x512xf32> -> vector<8x512xf32>
    %c0_3 = arith.constant 0 : index
    %c0_4 = arith.constant 0 : index
    %3 = vector.load %arg3[%c0_3, %c0_4] : memref<1x512xf32, #tpu.memory_space<vmem>>, vector<1x512xf32>
    %4 = vector.broadcast %3 : vector<1x512xf32> to vector<8x512xf32>
    %5 = arith.addf %2, %4 : vector<8x512xf32>
    %c0_5 = arith.constant 0 : index
    %c0_6 = arith.constant 0 : index
    %6 = vector.load %arg11[%c0_5, %c0_6] : memref<8x512xf32, #tpu.memory_space<vmem>>, vector<8x512xf32>
    tpu.vector_store %arg11[%c0_5, %c0_6], %5 {strides = array<i32>} : memref<8x512xf32, #tpu.memory_space<vmem>>, vector<8x512xf32>,
    %c0_7 = arith.constant 0 : index
    %c0_8 = arith.constant 0 : index
    %7 = vector.load %arg2[%c0_7, %c0_8] : memref<128x512xf32, #tpu.memory_space<vmem>>, vector<128x512xf32>
    %c0_9 = arith.constant 0 : index
    %c0_10 = arith.constant 0 : index
    %8 = vector.load %arg6[%c0_9, %c0_10] : memref<1x128xf32, #tpu.memory_space<vmem>>, vector<1x128xf32>
    %c0_11 = arith.constant 0 : index
    %c0_12 = arith.constant 0 : index
    %9 = vector.load %arg7[%c0_11, %c0_12] : memref<1x128xf32, #tpu.memory_space<vmem>>, vector<1x128xf32>
    %c0_i32 = arith.constant 0 : i32
    %10 = arith.index_cast %c0_i32 : i32 to index
    %c0_13 = arith.constant 0 : index
    %11 = vector.load %arg11[%10, %c0_13] : memref<8x512xf32, #tpu.memory_space<vmem>>, vector<1x512xf32>
    %cst_14 = arith.constant dense<0.000000e+00> : vector<1x512xf32>
    %12 = tpu.matmul %8, %7, %cst_14 {dimension_numbers = #tpu.dot_dimension_numbers<[1], [0], [0], [1], [0, 0, 1, 1], [], []>} : vector<1x128xf32>, vector<128x512xf32>, vector<1x512xf32> -> vector<1x512xf32>
    %13 = arith.addf %11, %12 : vector<1x512xf32>
    %14 = vector.extract_strided_slice %13 {offsets = [0, 0], sizes = [1, 256], strides = [1, 1]} : vector<1x512xf32> to vector<1x256xf32>
    %15 = arith.negf %14 : vector<1x256xf32>
    %16 = math.exp %15 : vector<1x256xf32>
    %cst_15 = arith.constant 1.000000e+00 : f32
    %17 = vector.broadcast %cst_15 : f32 to vector<1x256xf32>
    %18 = arith.addf %17, %16 : vector<1x256xf32>
    %19 = arith.divf %17, %18 : vector<1x256xf32>
    %20 = vector.extract_strided_slice %19 {offsets = [0, 0], sizes = [1, 128], strides = [1, 1]} : vector<1x256xf32> to vector<1x128xf32>
    %21 = vector.extract_strided_slice %19 {offsets = [0, 128], sizes = [1, 128], strides = [1, 1]} : vector<1x256xf32> to vector<1x128xf32>
    %22 = vector.extract_strided_slice %13 {offsets = [0, 256], sizes = [1, 128], strides = [1, 1]} : vector<1x512xf32> to vector<1x128xf32>
    %23 = math.tanh %22 : vector<1x128xf32>
    %24 = vector.extract_strided_slice %13 {offsets = [0, 384], sizes = [1, 128], strides = [1, 1]} : vector<1x512xf32> to vector<1x128xf32>
    %25 = arith.negf %24 : vector<1x128xf32>
    %26 = math.exp %25 : vector<1x128xf32>
    %cst_16 = arith.constant 1.000000e+00 : f32
    %27 = vector.broadcast %cst_16 : f32 to vector<1x128xf32>
    %28 = arith.addf %27, %26 : vector<1x128xf32>
    %29 = arith.divf %27, %28 : vector<1x128xf32>
    %30 = arith.mulf %21, %9 : vector<1x128xf32>
    %31 = arith.mulf %20, %23 : vector<1x128xf32>
    %32 = arith.addf %30, %31 : vector<1x128xf32>
    %33 = math.tanh %32 : vector<1x128xf32>
    %34 = arith.mulf %29, %33 : vector<1x128xf32>
    %35 = math.tanh %34 : vector<1x128xf32>
    %36 = arith.index_cast %c0_i32 : i32 to index
    %c0_17 = arith.constant 0 : index
    %37 = vector.load %arg12[%36, %c0_17] : memref<8x128xf32, #tpu.memory_space<vmem>>, vector<1x128xf32>
    tpu.vector_store %arg12[%36, %c0_17], %35 {strides = array<i32>} : memref<8x128xf32, #tpu.memory_space<vmem>>, vector<1x128xf32>,
    %c1_i32 = arith.constant 1 : i32
    %38 = arith.index_cast %c1_i32 : i32 to index
    %c0_18 = arith.constant 0 : index
    %39 = vector.load %arg11[%38, %c0_18] : memref<8x512xf32, #tpu.memory_space<vmem>>, vector<1x512xf32>
    %cst_19 = arith.constant dense<0.000000e+00> : vector<1x512xf32>
    %40 = tpu.matmul %34, %7, %cst_19 {dimension_numbers = #tpu.dot_dimension_numbers<[1], [0], [0], [1], [0, 0, 1, 1], [], []>} : vector<1x128xf32>, vector<128x512xf32>, vector<1x512xf32> -> vector<1x512xf32>
    %41 = arith.addf %39, %40 : vector<1x512xf32>
    %42 = vector.extract_strided_slice %41 {offsets = [0, 0], sizes = [1, 256], strides = [1, 1]} : vector<1x512xf32> to vector<1x256xf32>
    %43 = arith.negf %42 : vector<1x256xf32>
    %44 = math.exp %43 : vector<1x256xf32>
    %cst_20 = arith.constant 1.000000e+00 : f32
    %45 = vector.broadcast %cst_20 : f32 to vector<1x256xf32>
    %46 = arith.addf %45, %44 : vector<1x256xf32>
    %47 = arith.divf %45, %46 : vector<1x256xf32>
    %48 = vector.extract_strided_slice %47 {offsets = [0, 0], sizes = [1, 128], strides = [1, 1]} : vector<1x256xf32> to vector<1x128xf32>
    %49 = vector.extract_strided_slice %47 {offsets = [0, 128], sizes = [1, 128], strides = [1, 1]} : vector<1x256xf32> to vector<1x128xf32>
    %50 = vector.extract_strided_slice %41 {offsets = [0, 256], sizes = [1, 128], strides = [1, 1]} : vector<1x512xf32> to vector<1x128xf32>
    %51 = math.tanh %50 : vector<1x128xf32>
    %52 = vector.extract_strided_slice %41 {offsets = [0, 384], sizes = [1, 128], strides = [1, 1]} : vector<1x512xf32> to vector<1x128xf32>
    %53 = arith.negf %52 : vector<1x128xf32>
    %54 = math.exp %53 : vector<1x128xf32>
    %cst_21 = arith.constant 1.000000e+00 : f32
    %55 = vector.broadcast %cst_21 : f32 to vector<1x128xf32>
    %56 = arith.addf %55, %54 : vector<1x128xf32>
    %57 = arith.divf %55, %56 : vector<1x128xf32>
    %58 = arith.mulf %49, %32 : vector<1x128xf32>
    %59 = arith.mulf %48, %51 : vector<1x128xf32>
    %60 = arith.addf %58, %59 : vector<1x128xf32>
    %61 = math.tanh %60 : vector<1x128xf32>
    %62 = arith.mulf %57, %61 : vector<1x128xf32>
    %63 = math.tanh %62 : vector<1x128xf32>
    %64 = arith.index_cast %c1_i32 : i32 to index
    %c0_22 = arith.constant 0 : index
    %65 = vector.load %arg12[%64, %c0_22] : memref<8x128xf32, #tpu.memory_space<vmem>>, vector<1x128xf32>
    tpu.vector_store %arg12[%64, %c0_22], %63 {strides = array<i32>} : memref<8x128xf32, #tpu.memory_space<vmem>>, vector<1x128xf32>,
    %c2_i32 = arith.constant 2 : i32
    %66 = arith.index_cast %c2_i32 : i32 to index
    %c0_23 = arith.constant 0 : index
    %67 = vector.load %arg11[%66, %c0_23] : memref<8x512xf32, #tpu.memory_space<vmem>>, vector<1x512xf32>
    %cst_24 = arith.constant dense<0.000000e+00> : vector<1x512xf32>
    %68 = tpu.matmul %62, %7, %cst_24 {dimension_numbers = #tpu.dot_dimension_numbers<[1], [0], [0], [1], [0, 0, 1, 1], [], []>} : vector<1x128xf32>, vector<128x512xf32>, vector<1x512xf32> -> vector<1x512xf32>
    %69 = arith.addf %67, %68 : vector<1x512xf32>
    %70 = vector.extract_strided_slice %69 {offsets = [0, 0], sizes = [1, 256], strides = [1, 1]} : vector<1x512xf32> to vector<1x256xf32>
    %71 = arith.negf %70 : vector<1x256xf32>
    %72 = math.exp %71 : vector<1x256xf32>
    %cst_25 = arith.constant 1.000000e+00 : f32
    %73 = vector.broadcast %cst_25 : f32 to vector<1x256xf32>
    %74 = arith.addf %73, %72 : vector<1x256xf32>
    %75 = arith.divf %73, %74 : vector<1x256xf32>
    %76 = vector.extract_strided_slice %75 {offsets = [0, 0], sizes = [1, 128], strides = [1, 1]} : vector<1x256xf32> to vector<1x128xf32>
    %77 = vector.extract_strided_slice %75 {offsets = [0, 128], sizes = [1, 128], strides = [1, 1]} : vector<1x256xf32> to vector<1x128xf32>
    %78 = vector.extract_strided_slice %69 {offsets = [0, 256], sizes = [1, 128], strides = [1, 1]} : vector<1x512xf32> to vector<1x128xf32>
    %79 = math.tanh %78 : vector<1x128xf32>
    %80 = vector.extract_strided_slice %69 {offsets = [0, 384], sizes = [1, 128], strides = [1, 1]} : vector<1x512xf32> to vector<1x128xf32>
    %81 = arith.negf %80 : vector<1x128xf32>
    %82 = math.exp %81 : vector<1x128xf32>
    %cst_26 = arith.constant 1.000000e+00 : f32
    %83 = vector.broadcast %cst_26 : f32 to vector<1x128xf32>
    %84 = arith.addf %83, %82 : vector<1x128xf32>
    %85 = arith.divf %83, %84 : vector<1x128xf32>
    %86 = arith.mulf %77, %60 : vector<1x128xf32>
    %87 = arith.mulf %76, %79 : vector<1x128xf32>
    %88 = arith.addf %86, %87 : vector<1x128xf32>
    %89 = math.tanh %88 : vector<1x128xf32>
    %90 = arith.mulf %85, %89 : vector<1x128xf32>
    %91 = math.tanh %90 : vector<1x128xf32>
    %92 = arith.index_cast %c2_i32 : i32 to index
    %c0_27 = arith.constant 0 : index
    %93 = vector.load %arg12[%92, %c0_27] : memref<8x128xf32, #tpu.memory_space<vmem>>, vector<1x128xf32>
    tpu.vector_store %arg12[%92, %c0_27], %91 {strides = array<i32>} : memref<8x128xf32, #tpu.memory_space<vmem>>, vector<1x128xf32>,
    %c3_i32 = arith.constant 3 : i32
    %94 = arith.index_cast %c3_i32 : i32 to index
    %c0_28 = arith.constant 0 : index
    %95 = vector.load %arg11[%94, %c0_28] : memref<8x512xf32, #tpu.memory_space<vmem>>, vector<1x512xf32>
    %cst_29 = arith.constant dense<0.000000e+00> : vector<1x512xf32>
    %96 = tpu.matmul %90, %7, %cst_29 {dimension_numbers = #tpu.dot_dimension_numbers<[1], [0], [0], [1], [0, 0, 1, 1], [], []>} : vector<1x128xf32>, vector<128x512xf32>, vector<1x512xf32> -> vector<1x512xf32>
    %97 = arith.addf %95, %96 : vector<1x512xf32>
    %98 = vector.extract_strided_slice %97 {offsets = [0, 0], sizes = [1, 256], strides = [1, 1]} : vector<1x512xf32> to vector<1x256xf32>
    %99 = arith.negf %98 : vector<1x256xf32>
    %100 = math.exp %99 : vector<1x256xf32>
    %cst_30 = arith.constant 1.000000e+00 : f32
    %101 = vector.broadcast %cst_30 : f32 to vector<1x256xf32>
    %102 = arith.addf %101, %100 : vector<1x256xf32>
    %103 = arith.divf %101, %102 : vector<1x256xf32>
    %104 = vector.extract_strided_slice %103 {offsets = [0, 0], sizes = [1, 128], strides = [1, 1]} : vector<1x256xf32> to vector<1x128xf32>
    %105 = vector.extract_strided_slice %103 {offsets = [0, 128], sizes = [1, 128], strides = [1, 1]} : vector<1x256xf32> to vector<1x128xf32>
    %106 = vector.extract_strided_slice %97 {offsets = [0, 256], sizes = [1, 128], strides = [1, 1]} : vector<1x512xf32> to vector<1x128xf32>
    %107 = math.tanh %106 : vector<1x128xf32>
    %108 = vector.extract_strided_slice %97 {offsets = [0, 384], sizes = [1, 128], strides = [1, 1]} : vector<1x512xf32> to vector<1x128xf32>
    %109 = arith.negf %108 : vector<1x128xf32>
    %110 = math.exp %109 : vector<1x128xf32>
    %cst_31 = arith.constant 1.000000e+00 : f32
    %111 = vector.broadcast %cst_31 : f32 to vector<1x128xf32>
    %112 = arith.addf %111, %110 : vector<1x128xf32>
    %113 = arith.divf %111, %112 : vector<1x128xf32>
    %114 = arith.mulf %105, %88 : vector<1x128xf32>
    %115 = arith.mulf %104, %107 : vector<1x128xf32>
    %116 = arith.addf %114, %115 : vector<1x128xf32>
    %117 = math.tanh %116 : vector<1x128xf32>
    %118 = arith.mulf %113, %117 : vector<1x128xf32>
    %119 = math.tanh %118 : vector<1x128xf32>
    %120 = arith.index_cast %c3_i32 : i32 to index
    %c0_32 = arith.constant 0 : index
    %121 = vector.load %arg12[%120, %c0_32] : memref<8x128xf32, #tpu.memory_space<vmem>>, vector<1x128xf32>
    tpu.vector_store %arg12[%120, %c0_32], %119 {strides = array<i32>} : memref<8x128xf32, #tpu.memory_space<vmem>>, vector<1x128xf32>,
    %c4_i32 = arith.constant 4 : i32
    %122 = arith.index_cast %c4_i32 : i32 to index
    %c0_33 = arith.constant 0 : index
    %123 = vector.load %arg11[%122, %c0_33] : memref<8x512xf32, #tpu.memory_space<vmem>>, vector<1x512xf32>
    %cst_34 = arith.constant dense<0.000000e+00> : vector<1x512xf32>
    %124 = tpu.matmul %118, %7, %cst_34 {dimension_numbers = #tpu.dot_dimension_numbers<[1], [0], [0], [1], [0, 0, 1, 1], [], []>} : vector<1x128xf32>, vector<128x512xf32>, vector<1x512xf32> -> vector<1x512xf32>
    %125 = arith.addf %123, %124 : vector<1x512xf32>
    %126 = vector.extract_strided_slice %125 {offsets = [0, 0], sizes = [1, 256], strides = [1, 1]} : vector<1x512xf32> to vector<1x256xf32>
    %127 = arith.negf %126 : vector<1x256xf32>
    %128 = math.exp %127 : vector<1x256xf32>
    %cst_35 = arith.constant 1.000000e+00 : f32
    %129 = vector.broadcast %cst_35 : f32 to vector<1x256xf32>
    %130 = arith.addf %129, %128 : vector<1x256xf32>
    %131 = arith.divf %129, %130 : vector<1x256xf32>
    %132 = vector.extract_strided_slice %131 {offsets = [0, 0], sizes = [1, 128], strides = [1, 1]} : vector<1x256xf32> to vector<1x128xf32>
    %133 = vector.extract_strided_slice %131 {offsets = [0, 128], sizes = [1, 128], strides = [1, 1]} : vector<1x256xf32> to vector<1x128xf32>
    %134 = vector.extract_strided_slice %125 {offsets = [0, 256], sizes = [1, 128], strides = [1, 1]} : vector<1x512xf32> to vector<1x128xf32>
    %135 = math.tanh %134 : vector<1x128xf32>
    %136 = vector.extract_strided_slice %125 {offsets = [0, 384], sizes = [1, 128], strides = [1, 1]} : vector<1x512xf32> to vector<1x128xf32>
    %137 = arith.negf %136 : vector<1x128xf32>
    %138 = math.exp %137 : vector<1x128xf32>
    %cst_36 = arith.constant 1.000000e+00 : f32
    %139 = vector.broadcast %cst_36 : f32 to vector<1x128xf32>
    %140 = arith.addf %139, %138 : vector<1x128xf32>
    %141 = arith.divf %139, %140 : vector<1x128xf32>
    %142 = arith.mulf %133, %116 : vector<1x128xf32>
    %143 = arith.mulf %132, %135 : vector<1x128xf32>
    %144 = arith.addf %142, %143 : vector<1x128xf32>
    %145 = math.tanh %144 : vector<1x128xf32>
    %146 = arith.mulf %141, %145 : vector<1x128xf32>
    %147 = math.tanh %146 : vector<1x128xf32>
    %148 = arith.index_cast %c4_i32 : i32 to index
    %c0_37 = arith.constant 0 : index
    %149 = vector.load %arg12[%148, %c0_37] : memref<8x128xf32, #tpu.memory_space<vmem>>, vector<1x128xf32>
    tpu.vector_store %arg12[%148, %c0_37], %147 {strides = array<i32>} : memref<8x128xf32, #tpu.memory_space<vmem>>, vector<1x128xf32>,
    %c5_i32 = arith.constant 5 : i32
    %150 = arith.index_cast %c5_i32 : i32 to index
    %c0_38 = arith.constant 0 : index
    %151 = vector.load %arg11[%150, %c0_38] : memref<8x512xf32, #tpu.memory_space<vmem>>, vector<1x512xf32>
    %cst_39 = arith.constant dense<0.000000e+00> : vector<1x512xf32>
    %152 = tpu.matmul %146, %7, %cst_39 {dimension_numbers = #tpu.dot_dimension_numbers<[1], [0], [0], [1], [0, 0, 1, 1], [], []>} : vector<1x128xf32>, vector<128x512xf32>, vector<1x512xf32> -> vector<1x512xf32>
    %153 = arith.addf %151, %152 : vector<1x512xf32>
    %154 = vector.extract_strided_slice %153 {offsets = [0, 0], sizes = [1, 256], strides = [1, 1]} : vector<1x512xf32> to vector<1x256xf32>
    %155 = arith.negf %154 : vector<1x256xf32>
    %156 = math.exp %155 : vector<1x256xf32>
    %cst_40 = arith.constant 1.000000e+00 : f32
    %157 = vector.broadcast %cst_40 : f32 to vector<1x256xf32>
    %158 = arith.addf %157, %156 : vector<1x256xf32>
    %159 = arith.divf %157, %158 : vector<1x256xf32>
    %160 = vector.extract_strided_slice %159 {offsets = [0, 0], sizes = [1, 128], strides = [1, 1]} : vector<1x256xf32> to vector<1x128xf32>
    %161 = vector.extract_strided_slice %159 {offsets = [0, 128], sizes = [1, 128], strides = [1, 1]} : vector<1x256xf32> to vector<1x128xf32>
    %162 = vector.extract_strided_slice %153 {offsets = [0, 256], sizes = [1, 128], strides = [1, 1]} : vector<1x512xf32> to vector<1x128xf32>
    %163 = math.tanh %162 : vector<1x128xf32>
    %164 = vector.extract_strided_slice %153 {offsets = [0, 384], sizes = [1, 128], strides = [1, 1]} : vector<1x512xf32> to vector<1x128xf32>
    %165 = arith.negf %164 : vector<1x128xf32>
    %166 = math.exp %165 : vector<1x128xf32>
    %cst_41 = arith.constant 1.000000e+00 : f32
    %167 = vector.broadcast %cst_41 : f32 to vector<1x128xf32>
    %168 = arith.addf %167, %166 : vector<1x128xf32>
    %169 = arith.divf %167, %168 : vector<1x128xf32>
    %170 = arith.mulf %161, %144 : vector<1x128xf32>
    %171 = arith.mulf %160, %163 : vector<1x128xf32>
    %172 = arith.addf %170, %171 : vector<1x128xf32>
    %173 = math.tanh %172 : vector<1x128xf32>
    %174 = arith.mulf %169, %173 : vector<1x128xf32>
    %175 = math.tanh %174 : vector<1x128xf32>
    %176 = arith.index_cast %c5_i32 : i32 to index
    %c0_42 = arith.constant 0 : index
    %177 = vector.load %arg12[%176, %c0_42] : memref<8x128xf32, #tpu.memory_space<vmem>>, vector<1x128xf32>
    tpu.vector_store %arg12[%176, %c0_42], %175 {strides = array<i32>} : memref<8x128xf32, #tpu.memory_space<vmem>>, vector<1x128xf32>,
    %c6_i32 = arith.constant 6 : i32
    %178 = arith.index_cast %c6_i32 : i32 to index
    %c0_43 = arith.constant 0 : index
    %179 = vector.load %arg11[%178, %c0_43] : memref<8x512xf32, #tpu.memory_space<vmem>>, vector<1x512xf32>
    %cst_44 = arith.constant dense<0.000000e+00> : vector<1x512xf32>
    %180 = tpu.matmul %174, %7, %cst_44 {dimension_numbers = #tpu.dot_dimension_numbers<[1], [0], [0], [1], [0, 0, 1, 1], [], []>} : vector<1x128xf32>, vector<128x512xf32>, vector<1x512xf32> -> vector<1x512xf32>
    %181 = arith.addf %179, %180 : vector<1x512xf32>
    %182 = vector.extract_strided_slice %181 {offsets = [0, 0], sizes = [1, 256], strides = [1, 1]} : vector<1x512xf32> to vector<1x256xf32>
    %183 = arith.negf %182 : vector<1x256xf32>
    %184 = math.exp %183 : vector<1x256xf32>
    %cst_45 = arith.constant 1.000000e+00 : f32
    %185 = vector.broadcast %cst_45 : f32 to vector<1x256xf32>
    %186 = arith.addf %185, %184 : vector<1x256xf32>
    %187 = arith.divf %185, %186 : vector<1x256xf32>
    %188 = vector.extract_strided_slice %187 {offsets = [0, 0], sizes = [1, 128], strides = [1, 1]} : vector<1x256xf32> to vector<1x128xf32>
    %189 = vector.extract_strided_slice %187 {offsets = [0, 128], sizes = [1, 128], strides = [1, 1]} : vector<1x256xf32> to vector<1x128xf32>
    %190 = vector.extract_strided_slice %181 {offsets = [0, 256], sizes = [1, 128], strides = [1, 1]} : vector<1x512xf32> to vector<1x128xf32>
    %191 = math.tanh %190 : vector<1x128xf32>
    %192 = vector.extract_strided_slice %181 {offsets = [0, 384], sizes = [1, 128], strides = [1, 1]} : vector<1x512xf32> to vector<1x128xf32>
    %193 = arith.negf %192 : vector<1x128xf32>
    %194 = math.exp %193 : vector<1x128xf32>
    %cst_46 = arith.constant 1.000000e+00 : f32
    %195 = vector.broadcast %cst_46 : f32 to vector<1x128xf32>
    %196 = arith.addf %195, %194 : vector<1x128xf32>
    %197 = arith.divf %195, %196 : vector<1x128xf32>
    %198 = arith.mulf %189, %172 : vector<1x128xf32>
    %199 = arith.mulf %188, %191 : vector<1x128xf32>
    %200 = arith.addf %198, %199 : vector<1x128xf32>
    %201 = math.tanh %200 : vector<1x128xf32>
    %202 = arith.mulf %197, %201 : vector<1x128xf32>
    %203 = math.tanh %202 : vector<1x128xf32>
    %204 = arith.index_cast %c6_i32 : i32 to index
    %c0_47 = arith.constant 0 : index
    %205 = vector.load %arg12[%204, %c0_47] : memref<8x128xf32, #tpu.memory_space<vmem>>, vector<1x128xf32>
    tpu.vector_store %arg12[%204, %c0_47], %203 {strides = array<i32>} : memref<8x128xf32, #tpu.memory_space<vmem>>, vector<1x128xf32>,
    %c7_i32 = arith.constant 7 : i32
    %206 = arith.index_cast %c7_i32 : i32 to index
    %c0_48 = arith.constant 0 : index
    %207 = vector.load %arg11[%206, %c0_48] : memref<8x512xf32, #tpu.memory_space<vmem>>, vector<1x512xf32>
    %cst_49 = arith.constant dense<0.000000e+00> : vector<1x512xf32>
    %208 = tpu.matmul %202, %7, %cst_49 {dimension_numbers = #tpu.dot_dimension_numbers<[1], [0], [0], [1], [0, 0, 1, 1], [], []>} : vector<1x128xf32>, vector<128x512xf32>, vector<1x512xf32> -> vector<1x512xf32>
    %209 = arith.addf %207, %208 : vector<1x512xf32>
    %210 = vector.extract_strided_slice %209 {offsets = [0, 0], sizes = [1, 256], strides = [1, 1]} : vector<1x512xf32> to vector<1x256xf32>
    %211 = arith.negf %210 : vector<1x256xf32>
    %212 = math.exp %211 : vector<1x256xf32>
    %cst_50 = arith.constant 1.000000e+00 : f32
    %213 = vector.broadcast %cst_50 : f32 to vector<1x256xf32>
    %214 = arith.addf %213, %212 : vector<1x256xf32>
    %215 = arith.divf %213, %214 : vector<1x256xf32>
    %216 = vector.extract_strided_slice %215 {offsets = [0, 0], sizes = [1, 128], strides = [1, 1]} : vector<1x256xf32> to vector<1x128xf32>
    %217 = vector.extract_strided_slice %215 {offsets = [0, 128], sizes = [1, 128], strides = [1, 1]} : vector<1x256xf32> to vector<1x128xf32>
    %218 = vector.extract_strided_slice %209 {offsets = [0, 256], sizes = [1, 128], strides = [1, 1]} : vector<1x512xf32> to vector<1x128xf32>
    %219 = math.tanh %218 : vector<1x128xf32>
    %220 = vector.extract_strided_slice %209 {offsets = [0, 384], sizes = [1, 128], strides = [1, 1]} : vector<1x512xf32> to vector<1x128xf32>
    %221 = arith.negf %220 : vector<1x128xf32>
    %222 = math.exp %221 : vector<1x128xf32>
    %cst_51 = arith.constant 1.000000e+00 : f32
    %223 = vector.broadcast %cst_51 : f32 to vector<1x128xf32>
    %224 = arith.addf %223, %222 : vector<1x128xf32>
    %225 = arith.divf %223, %224 : vector<1x128xf32>
    %226 = arith.mulf %217, %200 : vector<1x128xf32>
    %227 = arith.mulf %216, %219 : vector<1x128xf32>
    %228 = arith.addf %226, %227 : vector<1x128xf32>
    %229 = math.tanh %228 : vector<1x128xf32>
    %230 = arith.mulf %225, %229 : vector<1x128xf32>
    %231 = math.tanh %230 : vector<1x128xf32>
    %232 = arith.index_cast %c7_i32 : i32 to index
    %c0_52 = arith.constant 0 : index
    %233 = vector.load %arg12[%232, %c0_52] : memref<8x128xf32, #tpu.memory_space<vmem>>, vector<1x128xf32>
    tpu.vector_store %arg12[%232, %c0_52], %231 {strides = array<i32>} : memref<8x128xf32, #tpu.memory_space<vmem>>, vector<1x128xf32>,
    %c8_i32 = arith.constant 8 : i32
    %c0_53 = arith.constant 0 : index
    %c0_54 = arith.constant 0 : index
    %234 = vector.load %arg12[%c0_53, %c0_54] : memref<8x128xf32, #tpu.memory_space<vmem>>, vector<8x128xf32>
    %c0_55 = arith.constant 0 : index
    %c0_56 = arith.constant 0 : index
    %235 = vector.load %arg4[%c0_55, %c0_56] : memref<128x128xf32, #tpu.memory_space<vmem>>, vector<128x128xf32>
    %cst_57 = arith.constant dense<0.000000e+00> : vector<8x128xf32>
    %236 = tpu.matmul %234, %235, %cst_57 {dimension_numbers = #tpu.dot_dimension_numbers<[1], [0], [0], [1], [0, 0, 1, 1], [], []>} : vector<8x128xf32>, vector<128x128xf32>, vector<8x128xf32> -> vector<8x128xf32>
    %c0_58 = arith.constant 0 : index
    %c0_59 = arith.constant 0 : index
    %237 = vector.load %arg5[%c0_58, %c0_59] : memref<1x128xf32, #tpu.memory_space<vmem>>, vector<1x128xf32>
    %238 = vector.broadcast %237 : vector<1x128xf32> to vector<8x128xf32>
    %239 = arith.addf %236, %238 : vector<8x128xf32>
    %c0_60 = arith.constant 0 : index
    %c0_61 = arith.constant 0 : index
    %240 = vector.load %arg8[%c0_60, %c0_61] : memref<8x128xf32, #tpu.memory_space<vmem>>, vector<8x128xf32>
    tpu.vector_store %arg8[%c0_60, %c0_61], %239 {strides = array<i32>} : memref<8x128xf32, #tpu.memory_space<vmem>>, vector<8x128xf32>,
    %c0_62 = arith.constant 0 : index
    %c0_63 = arith.constant 0 : index
    %241 = vector.load %arg9[%c0_62, %c0_63] : memref<1x128xf32, #tpu.memory_space<vmem>>, vector<1x128xf32>
    tpu.vector_store %arg9[%c0_62, %c0_63], %230 {strides = array<i32>} : memref<1x128xf32, #tpu.memory_space<vmem>>, vector<1x128xf32>,
    %c0_64 = arith.constant 0 : index
    %c0_65 = arith.constant 0 : index
    %242 = vector.load %arg10[%c0_64, %c0_65] : memref<1x128xf32, #tpu.memory_space<vmem>>, vector<1x128xf32>
    tpu.vector_store %arg10[%c0_64, %c0_65], %228 {strides = array<i32>} : memref<1x128xf32, #tpu.memory_space<vmem>>, vector<1x128xf32>,
    return
  }
}

</mosaic_0001>

<bundles_post_ra>
// kernel: tpu_custom_call.1
= control target key start
LH: loop header
LB: loop body
LE: loop exit
PB: predicated region body
PF: predicated region fallthrough
CT: control target
= control target key end

     0   :  { %16 = vsyncpa [#allocation5], 0  ;;  %s3494_s0 = inlined_call_operand.vmem [shape: f32[8,2], index: 0, kind: input, shape index: {}]   ;;  %s3495_s1 = inlined_call_operand.vmem [shape: f32[2,512], index: 1, kind: input, shape index: {}]   ;;  %s3496_s2 = inlined_call_operand.hbm [shape: f32[128,512], index: 2, kind: input, shape index: {}]   ;;  %s3497_s3 = inlined_call_operand.vmem [shape: f32[1,512], index: 3, kind: input, shape index: {}]   ;;  %s3498_s4 = inlined_call_operand.hbm [shape: f32[128,128], index: 4, kind: input, shape index: {}]   ;;  %s3499_s5 = inlined_call_operand.vmem [shape: f32[1,128], index: 5, kind: input, shape index: {}]   ;;  %s3500_s6 = inlined_call_operand.vmem [shape: f32[1,128], index: 6, kind: input, shape index: {}]   ;;  %s3501_s7 = inlined_call_operand.vmem [shape: f32[1,128], index: 7, kind: input, shape index: {}]   ;;  %s3502_s8 = inlined_call_operand.hbm [shape: f32[8,128], index: 8, kind: output, shape index: {0}]   ;;  %s3503_s9 = inlined_call_operand.hbm [shape: f32[1,128], index: 9, kind: output, shape index: {1}]   ;;  %s3504_s10 = inlined_call_operand.hbm [shape: f32[1,128], index: 10, kind: output, shape index: {2}]  }
   0x1   :  { %17 = vsyncpa [#allocation8], 0 }
   0x2   :  { %18 = vsyncpa [#allocation6], 0 }
   0x3   :  { %19 = vsyncpa [#allocation11], 0  ;;  %s2940_s13 = smov [#allocation4]   ;;  %s2822_s17 = scalar_lea.hbm %s3496_s2, 8192 }
   0x4   :  { %s29_s14 = sshll.u32 %s2940_s13, 4  ;;  %p2823_p0 = scmp.ne.s32.totalorder %s3496_s2, %s2822_s17  ;;  %s30_s14 = int_to_ptr.vmem [resolvable:$true] %s29_s14 }
   0x5   :  { %p2826_p1 = scmp.lt.u32.totalorder %s2822_s17, %s3496_s2 }
   0x7   :  { %p2828_p2 = pnand %p2826_p1, %p2823_p0 }
   0x9   :  { %2831 = shalt.err (!%p2828_p2)
}
   0xa   :  { %s2832_s22 = scalar_lea.vmem %s30_s14, 8192  ;;  %p2837_p4 = scmp.lt.s32.totalorder %s30_s14, %s30_s14 }
   0xb   :  { %p2833_p3 = scmp.ne.s32.totalorder %s30_s14, %s2832_s22  ;;  %p2838_p5 = scmp.lt.s32.totalorder %s2832_s22, %s2832_s22 }
   0xd   :  { %p2839_p6 = por %p2838_p5, %p2837_p4 }
   0xf   :  { %p2840_p7 = pnand %p2839_p6, %p2833_p3 }
  0x11   :  { %2843 = shalt.err (!%p2840_p7)
}
  0x12   :  { %s2941_s23 = smov 512   ;;  %s2942_s24 = smov 32  }
  0x13   :  { %35 = dma.hbm_to_vmem [thread:$0]  %s3496_s2, 8192, %s30_s14, [#allocation5], %s2941_s23, %s2941_s23, %s2942_s24  }
  0x14   :  { %s2943_s27 = smov [#allocation7]   ;;  %s2844_s11 = scalar_lea.hbm %s3498_s4, 2048 }
  0x15   :  { %s43_s28 = sshll.u32 %s2943_s27, 4  ;;  %p2845_p8 = scmp.ne.s32.totalorder %s3498_s4, %s2844_s11  ;;  %s44_s28 = int_to_ptr.vmem [resolvable:$true] %s43_s28 }
  0x16   :  { %p2848_p9 = scmp.lt.u32.totalorder %s2844_s11, %s3498_s4 }
  0x18   :  { %p2850_p10 = pnand %p2848_p9, %p2845_p8 }
  0x1a   :  { %2853 = shalt.err (!%p2850_p10)
}
  0x1b   :  { %s2854_s17 = scalar_lea.vmem %s44_s28, 2048  ;;  %p2859_p12 = scmp.lt.s32.totalorder %s44_s28, %s44_s28 }
  0x1c   :  { %p2855_p11 = scmp.ne.s32.totalorder %s44_s28, %s2854_s17  ;;  %p2860_p13 = scmp.lt.s32.totalorder %s2854_s17, %s2854_s17 }
  0x1e   :  { %p2861_p0 = por %p2860_p13, %p2859_p12 }
  0x20   :  { %p2862_p1 = pnand %p2861_p0, %p2855_p11 }
  0x22   :  { %2865 = shalt.err (!%p2862_p1)
}
  0x23   :  { %s2944_s2 = smov 128   ;;  %s2945_s14 = smov 8  }
  0x24   :  { %49 = dma.hbm_to_vmem [thread:$0]  %s3498_s4, 2048, %s44_s28, [#allocation8], %s2944_s2, %s2944_s2, %s2945_s14  }
  0x25   :  { %2932 = dma.done.wait [#allocation5], 8192  }
  0x26   :  { %2933 = vsyncadd [#allocation5], 4294959104 }
  0x27   :  { %2934 = dma.done.wait [#allocation8], 2048  }
  0x28   :  { %2935 = vsyncadd [#allocation8], 4294965248  ;;  %v66_v0 = vlaneseq  ;;  %v2946_v1 = vmov 1983009808   ;;  %v2947_v3 = vmov 0.0   ;;  %v63_v7 = vld [vmem:[%s3495_s1] sm:$0xff] }
  0x29   :  { %v89_v2 = vunpack.c.l.s4 %v2946_v1  ;;  %181 = vmatprep.mubr.f32.mxu1 %v2947_v3  ;;  %394 = vmatprep.mubr.f32.mxu0 %v2947_v3  ;;  %v264_v8 = vld [vmem:[#allocation4 + $0x8] sm:$0xff]  ;;  %v87_v9 = vcombine.high %v63_v7, %v63_v7  ;;  %v266_v12 = vld [vmem:[#allocation4 + $0x18] sm:$0xff]  ;;  %vm108_vm0 = vcmask 1041408   ;;  %v263_v15 = vld [vmem:[#allocation4] sm:$0xff]  ;;  %vm104_vm1 = vcmask 15360  }
  0x2a   :  { %v3035_v4 = vshrl.u32 %v66_v0, 7  ;;  %v268_v11 = vld [vmem:[#allocation4 + $0x28] sm:$0xff]  ;;  %v270_v14 = vld [vmem:[#allocation4 + $0x38] sm:$0xff]  ;;  %v267_v16 = vld [vmem:[#allocation4 + $0x20] sm:$0xff]  ;;  %vm2950_vm2 = vmmov 0  }
  0x2b   :  { %v90_v5 = vunpack.c.0.s8 %v89_v2  ;;  %v3041_v13 = vpack.c.bf16 %v268_v11, %v264_v8  ;;  %v3043_v19 = vpack.c.bf16 %v267_v16, %v263_v15  ;;  %v272_v20 = vld [vmem:[#allocation4 + $0x48] sm:$0xff]  ;;  %v62_v22 = vld [vmem:[%s3494_s0] sm:$0xff]  ;;  %v271_v25 = vld [vmem:[#allocation4 + $0x40] sm:$0xff]  ;;  %v3052_v27 = vpack.c.bf16 %v270_v14, %v266_v12 }
  0x2c   :  { %v276_v21 = vld [vmem:[#allocation4 + $0x68] sm:$0xff]  ;;  %v265_v23 = vld [vmem:[#allocation4 + $0x10] sm:$0xff]  ;;  %v274_v29 = vld [vmem:[#allocation4 + $0x58] sm:$0xff] }
  0x2d   :  { %v93_v6 = vsub.s32 %v90_v5, %v3035_v4  ;;  %2160 = vmatprep.subr.bf16.mxu0 %v3041_v13  ;;  %v3049_v24 = vpack.c.bf16 %v276_v21, %v272_v20  ;;  %v269_v28 = vld [vmem:[#allocation4 + $0x30] sm:$0xff]  ;;  %v275_v30 = vld [vmem:[#allocation4 + $0x60] sm:$0xff]  ;;  %v278_v31 = vld [vmem:[#allocation4 + $0x78] sm:$0xff] }
  0x2e   :  { %2162 = vmatpush1.bf16.msra.mxu0 %v3043_v19  ;;  %v3057_v32 = vpack.c.bf16 %v275_v30, %v271_v25  ;;  %v280_v33 = vld [vmem:[#allocation4 + $0x88] sm:$0xff]  ;;  %v279_v36 = vld [vmem:[#allocation4 + $0x80] sm:$0xff]  ;;  %v3065_v38 = vpack.c.bf16 %v269_v28, %v265_v23  ;;  %v273_v39 = vld [vmem:[#allocation4 + $0x50] sm:$0xff]  ;;  %v3068_v41 = vpack.c.bf16 %v278_v31, %v274_v29 }
  0x2f   :  { %v94_v10 = vrot.slane %v63_v7, %v93_v6  ;;  %v101_v17 = vrot.slane %v87_v9, %v93_v6  ;;  %2164 = vmatprep.subr.bf16.mxu0 %v3049_v24  ;;  %v284_v34 = vld [vmem:[#allocation4 + $0xa8] sm:$0xff]  ;;  %v283_v37 = vld [vmem:[#allocation4 + $0xa0] sm:$0xff]  ;;  %v277_v42 = vld [vmem:[#allocation4 + $0x70] sm:$0xff] }
  0x30   :  { %v3061_v35 = vpack.c.bf16 %v284_v34, %v280_v33  ;;  %v288_v40 = vld [vmem:[#allocation4 + $0xc8] sm:$0xff]  ;;  %v282_v43 = vld [vmem:[#allocation4 + $0x98] sm:$0xff]  ;;  %v3071_v44 = vpack.c.bf16 %v283_v37, %v279_v36  ;;  %v287_v48 = vld [vmem:[#allocation4 + $0xc0] sm:$0xff]  ;;  %v3078_v52 = vpack.c.bf16 %v277_v42, %v273_v39 }
  0x31   :  { %v102_v18 = vcombine.high %v94_v10, %v94_v10  ;;  %v103_v26 = vcombine.high %v101_v17, %v101_v17  ;;  %v292_v45 = vld [vmem:[#allocation4 + $0xe8] sm:$0xff]  ;;  %v286_v46 = vld [vmem:[#allocation4 + $0xb8] sm:$0xff]  ;;  %v291_v49 = vld [vmem:[#allocation4 + $0xe0] sm:$0xff] }
  0x32   :  { %2166 = vmatpush1.bf16.msra.mxu0 %v3057_v32  ;;  %v3074_v47 = vpack.c.bf16 %v292_v45, %v288_v40  ;;  %v296_v50 = vld [vmem:[#allocation4 + $0x108] sm:$0xff]  ;;  %v3082_v53 = vpack.c.bf16 %v286_v46, %v282_v43  ;;  %v281_v54 = vld [vmem:[#allocation4 + $0x90] sm:$0xff]  ;;  %v290_v56 = vld [vmem:[#allocation4 + $0xd8] sm:$0xff]  ;;  %v3085_v57 = vpack.c.bf16 %v291_v49, %v287_v48 }
  0x33   :  { %2084 = vmatprep.subr.msk.mxu1 %vm108_vm0, %v102_v18  ;;  %2168 = vmatprep.subr.bf16.mxu0 %v3061_v35  ;;  %v300_v51 = vld [vmem:[#allocation4 + $0x128] sm:$0xff]  ;;  %v285_v55 = vld [vmem:[#allocation4 + $0xb0] sm:$0xff]  ;;  %v294_v58 = vld [vmem:[#allocation4 + $0xf8] sm:$0xff] }
  0x34   :  { %2085 = vmatpush1.msk.msra.mxu1 %vm108_vm0, %v94_v10  ;;  %v3088_v59 = vpack.c.bf16 %v300_v51, %v296_v50  ;;  %v295_v60 = vld [vmem:[#allocation4 + $0x100] sm:$0xff]  ;;  %v304_v62 = vld [vmem:[#allocation4 + $0x148] sm:$0xff]  ;;  %v3091_v0 = vpack.c.bf16 %v285_v55, %v281_v54  ;;  %v3094_v1 = vpack.c.bf16 %v294_v58, %v290_v56  ;;  %v289_v2 = vld [vmem:[#allocation4 + $0xd0] sm:$0xff] }
  0x35   :  { %2086 = vmatmul.mubr.msk.f32.vlgmr.msra.gmra.mrb[0].mxu1 %vm104_vm1, %v62_v22  ;;  %2087 = vmatprep.subr.msk.mxu1 %vm108_vm0, %v103_v26  ;;  %v299_v61 = vld [vmem:[#allocation4 + $0x120] sm:$0xff]  ;;  %v308_v63 = vld [vmem:[#allocation4 + $0x168] sm:$0xff]  ;;  %v293_v5 = vld [vmem:[#allocation4 + $0xf0] sm:$0xff] }
  0x36   :  { %2088 = vmatpush1.msk.msra.mxu1 %vm108_vm0, %v101_v17  ;;  %252 = vmatprep.mubr.f32.mxu1 %v2947_v3  ;;  %v298_v6 = vld [vmem:[#allocation4 + $0x118] sm:$0xff]  ;;  %v3097_v7 = vpack.c.bf16 %v299_v61, %v295_v60  ;;  %v3100_v9 = vpack.c.bf16 %v308_v63, %v304_v62  ;;  %v303_v10 = vld [vmem:[#allocation4 + $0x140] sm:$0xff]  ;;  %v312_v12 = vld [vmem:[#allocation4 + $0x188] sm:$0xff]  ;;  %v3103_v15 = vpack.c.bf16 %v293_v5, %v289_v2  ;;  %v68_v63 = vsub.s32 0, %v3035_v4 }
  0x37   :  { %2192 = vmatprep.subr.bf16.mxu1 %v3052_v27  ;;  %2170 = vmatpush1.bf16.msra.mxu0 %v3071_v44  ;;  %v302_v8 = vld [vmem:[#allocation4 + $0x138] sm:$0xff]  ;;  %v307_v11 = vld [vmem:[#allocation4 + $0x160] sm:$0xff]  ;;  %v316_v14 = vld [vmem:[#allocation4 + $0x1a8] sm:$0xff]  ;;  %v72_v5 = vsub.s32 1, %v3035_v4 }
  0x38   :  { %2172 = vmatprep.subr.bf16.mxu0 %v3074_v47  ;;  %v3106_v16 = vpack.c.bf16 %v302_v8, %v298_v6  ;;  %v297_v17 = vld [vmem:[#allocation4 + $0x110] sm:$0xff]  ;;  %v306_v20 = vld [vmem:[#allocation4 + $0x158] sm:$0xff]  ;;  %v3109_v21 = vpack.c.bf16 %v307_v11, %v303_v10  ;;  %v3112_v23 = vpack.c.bf16 %v316_v14, %v312_v12  ;;  %v311_v25 = vld [vmem:[#allocation4 + $0x180] sm:$0xff]  ;;  %v76_v8 = vsub.s32 2, %v3035_v4 }
  0x39   :  { %2089 = vmatmul.mubr.msk.f32.vlgmr.msra.gmra.mrb[2].mxu1 %vm104_vm1, %v62_v22  ;;  %v301_v18 = vld [vmem:[#allocation4 + $0x130] sm:$0xff]  ;;  %v310_v22 = vld [vmem:[#allocation4 + $0x178] sm:$0xff]  ;;  %v315_v26 = vld [vmem:[#allocation4 + $0x1a0] sm:$0xff]  ;;  %v80_v11 = vsub.s32 3, %v3035_v4 }
  0x3a   :  { %2194 = vmatpush1.bf16.msra.mxu1 %v3065_v38  ;;  %465 = vmatprep.mubr.f32.mxu1 %v2947_v3  ;;  %v320_v28 = vld [vmem:[#allocation4 + $0x1c8] sm:$0xff]  ;;  %v3115_v30 = vpack.c.bf16 %v301_v18, %v297_v17  ;;  %v3118_v31 = vpack.c.bf16 %v310_v22, %v306_v20  ;;  %v305_v33 = vld [vmem:[#allocation4 + $0x150] sm:$0xff]  ;;  %v314_v36 = vld [vmem:[#allocation4 + $0x198] sm:$0xff]  ;;  %v3121_v37 = vpack.c.bf16 %v315_v26, %v311_v25 }
  0x3b   :  { %2196 = vmatprep.subr.bf16.mxu1 %v3068_v41  ;;  %2174 = vmatpush1.bf16.msra.mxu0 %v3085_v57  ;;  %v324_v29 = vld [vmem:[#allocation4 + $0x1e8] sm:$0xff]  ;;  %v309_v34 = vld [vmem:[#allocation4 + $0x170] sm:$0xff]  ;;  %v318_v39 = vld [vmem:[#allocation4 + $0x1b8] sm:$0xff] }
  0x3c   :  { %2176 = vmatprep.subr.bf16.mxu0 %v3088_v59  ;;  %v3124_v40 = vpack.c.bf16 %v324_v29, %v320_v28  ;;  %v319_v42 = vld [vmem:[#allocation4 + $0x1c0] sm:$0xff]  ;;  %v3127_v45 = vpack.c.bf16 %v309_v34, %v305_v33  ;;  %v3130_v46 = vpack.c.bf16 %v318_v39, %v314_v36  ;;  %v313_v48 = vld [vmem:[#allocation4 + $0x190] sm:$0xff]  ;;  %v322_v51 = vld [vmem:[#allocation4 + $0x1d8] sm:$0xff]  ;;  %v2948_v33 = vmov 1966171168  }
  0x3d   :  { %v323_v43 = vld [vmem:[#allocation4 + $0x1e0] sm:$0xff]  ;;  %v317_v49 = vld [vmem:[#allocation4 + $0x1b0] sm:$0xff]  ;;  %v326_v54 = vld [vmem:[#allocation4 + $0x1f8] sm:$0xff]  ;;  %v479_v34 = vunpack.c.l.s4 %v2948_v33 }
  0x3e   :  { %2198 = vmatpush1.bf16.msra.mxu1 %v3078_v52  ;;  %v3133_v50 = vpack.c.bf16 %v323_v43, %v319_v42  ;;  %v3137_v55 = vpack.c.bf16 %v317_v49, %v313_v48  ;;  %v3140_v56 = vpack.c.bf16 %v326_v54, %v322_v51  ;;  %v321_v58 = vld [vmem:[#allocation4 + $0x1d0] sm:$0xff] }
  0x3f   :  { %2200 = vmatprep.subr.bf16.mxu1 %v3082_v53  ;;  %2178 = vmatpush1.bf16.msra.mxu0 %v3097_v7  ;;  %v325_v60 = vld [vmem:[#allocation4 + $0x1f0] sm:$0xff]  ;;  %v480_v39 = vunpack.c.0.s8 %v479_v34 }
  0x40   :  { %2180 = vmatprep.subr.bf16.mxu0 %v3100_v9  ;;  %v327_v61 = vld [vmem:[%s3500_s6] sm:$0x1]  ;;  %v3148_v62 = vpack.c.bf16 %v325_v60, %v321_v58 }
  0x41   :  { %v64_v2 = vld [vmem:[%s3497_s3] sm:$0xf]  ;;  %v3195_v48 = vsub.s32 %v480_v39, %v3035_v4 }
  0x42   :  { %2202 = vmatpush1.bf16.msra.mxu1 %v3091_v0  ;;  %v69_v6 = vrot.slane %v64_v2, %v68_v63  ;;  %v73_v10 = vrot.slane %v64_v2, %v72_v5  ;;  %v77_v18 = vrot.slane %v64_v2, %v76_v8  ;;  %v81_v22 = vrot.slane %v64_v2, %v80_v11 }
  0x43   :  { %2204 = vmatprep.subr.bf16.mxu1 %v3094_v1  ;;  %2182 = vmatpush1.bf16.msra.mxu0 %v3109_v21 }
  0x44   :  { %2184 = vmatprep.subr.bf16.mxu0 %v3112_v23 }
  0x46   :  { %2206 = vmatpush1.bf16.msra.mxu1 %v3103_v15 }
  0x47   :  { %2208 = vmatprep.subr.bf16.mxu1 %v3106_v16  ;;  %2186 = vmatpush1.bf16.msra.mxu0 %v3121_v37 }
  0x48   :  { %2188 = vmatprep.subr.bf16.mxu0 %v3124_v40 }
  0x4a   :  { %2210 = vmatpush1.bf16.msra.mxu1 %v3115_v30 }
  0x4b   :  { %2212 = vmatprep.subr.bf16.mxu1 %v3118_v31  ;;  %2190 = vmatpush1.bf16.msra.mxu0 %v3133_v50 }
  0x4c   :  { %2224 = vmatprep.subr.bf16.mxu0 %v3041_v13 }
  0x4e   :  { %2214 = vmatpush1.bf16.msra.mxu1 %v3127_v45  ;;  %395 = vmatmul.mubr.f32.vlgmr.msra.gmra.mrb[0].mxu0 %v327_v61 }
  0x4f   :  { %2216 = vmatprep.subr.bf16.mxu1 %v3130_v46  ;;  %2226 = vmatpush1.bf16.msra.mxu0 %v3043_v19 }
  0x50   :  { %2228 = vmatprep.subr.bf16.mxu0 %v3049_v24  ;;  %596 = vmatprep.mubr.f32.mxu0 %v2947_v3 }
  0x52   :  { %2218 = vmatpush1.bf16.msra.mxu1 %v3137_v55 }
  0x53   :  { %2220 = vmatprep.subr.bf16.mxu1 %v3140_v56  ;;  %2230 = vmatpush1.bf16.msra.mxu0 %v3057_v32 }
  0x54   :  { %2232 = vmatprep.subr.bf16.mxu0 %v3061_v35 }
  0x56   :  { %2222 = vmatpush1.bf16.msra.mxu1 %v3148_v62 }
  0x57   :  { %2256 = vmatprep.subr.bf16.mxu1 %v3052_v27  ;;  %2234 = vmatpush1.bf16.msra.mxu0 %v3071_v44 }
  0x58   :  { %2236 = vmatprep.subr.bf16.mxu0 %v3074_v47 }
  0x59   :  { %466 = vmatmul.mubr.f32.vlgmr.msra.gmra.mrb[4].mxu1 %v327_v61 }
  0x5a   :  { %2258 = vmatpush1.bf16.msra.mxu1 %v3065_v38  ;;  %667 = vmatprep.mubr.f32.mxu1 %v2947_v3 }
  0x5b   :  { %2260 = vmatprep.subr.bf16.mxu1 %v3068_v41  ;;  %2238 = vmatpush1.bf16.msra.mxu0 %v3085_v57 }
  0x5c   :  { %2240 = vmatprep.subr.bf16.mxu0 %v3088_v59 }
  0x5e   :  { %2262 = vmatpush1.bf16.msra.mxu1 %v3078_v52 }
  0x5f   :  { %2264 = vmatprep.subr.bf16.mxu1 %v3082_v53  ;;  %2242 = vmatpush1.bf16.msra.mxu0 %v3097_v7 }
  0x60   :  { %2244 = vmatprep.subr.bf16.mxu0 %v3100_v9 }
  0x62   :  { %2266 = vmatpush1.bf16.msra.mxu1 %v3091_v0 }
  0x63   :  { %2268 = vmatprep.subr.bf16.mxu1 %v3094_v1  ;;  %2246 = vmatpush1.bf16.msra.mxu0 %v3109_v21 }
  0x64   :  { %2248 = vmatprep.subr.bf16.mxu0 %v3112_v23 }
  0x66   :  { %2270 = vmatpush1.bf16.msra.mxu1 %v3103_v15 }
  0x67   :  { %2272 = vmatprep.subr.bf16.mxu1 %v3106_v16  ;;  %2250 = vmatpush1.bf16.msra.mxu0 %v3121_v37 }
  0x68   :  { %2252 = vmatprep.subr.bf16.mxu0 %v3124_v40 }
  0x6a   :  { %2274 = vmatpush1.bf16.msra.mxu1 %v3115_v30 }
  0x6b   :  { %2276 = vmatprep.subr.bf16.mxu1 %v3118_v31  ;;  %2254 = vmatpush1.bf16.msra.mxu0 %v3133_v50 }
  0x6c   :  { %2288 = vmatprep.subr.bf16.mxu0 %v3041_v13 }
  0x6e   :  { %2278 = vmatpush1.bf16.msra.mxu1 %v3127_v45 }
  0x6f   :  { %2280 = vmatprep.subr.bf16.mxu1 %v3130_v46 }
  0x72   :  { %2282 = vmatpush1.bf16.msra.mxu1 %v3137_v55 }
  0x73   :  { %2284 = vmatprep.subr.bf16.mxu1 %v3140_v56 }
  0x76   :  { %2286 = vmatpush1.bf16.msra.mxu1 %v3148_v62 }
  0x77   :  { %2320 = vmatprep.subr.bf16.mxu1 %v3052_v27 }
 0x108   :  { %v183_v12 = vpop.f32.mrb[0].mxu1 }
 0x109   :  { %v184_v14 = vadd.f32 %v183_v12, %v69_v6  ;;  %v185_v17 = vpop.f32.mrb[1].mxu1 }
 0x10a   :  { %v186_v20 = vadd.f32 %v185_v17, %v73_v10 }
 0x10b   :  { %259 = vst [vmem:[#allocation2] sm:$0xff] %v184_v14 }
 0x10c   :  { %260 = vst [vmem:[#allocation2 + $0x8] sm:$0xff] %v186_v20  ;;  %v254_v25 = vpop.f32.mrb[2].mxu1 }
 0x10d   :  { %v255_v26 = vadd.f32 %v254_v25, %v77_v18  ;;  %v256_v28 = vpop.f32.mrb[3].mxu1  ;;  %v328_v18 = vld [vmem:[%s3501_s7] sm:$0x1]  ;;  %s2951_s7 = smov [#allocation10]  }
 0x10e   :  { %v257_v29 = vadd.f32 %v256_v28, %v81_v22  ;;  %s2057_s25 = sshll.u32 %s2951_s7, 4  ;;  %s2058_s25 = int_to_ptr.vmem [resolvable:$true] %s2057_s25 }
 0x10f   :  { %261 = vst [vmem:[#allocation2 + $0x10] sm:$0xff] %v255_v26  ;;  %s2866_s26 = scalar_lea.vmem %s2058_s25, 16  ;;  %s2870_s27 = scalar_lea.vmem %s2058_s25, 32 }
 0x110   :  { %262 = vst [vmem:[#allocation2 + $0x18] sm:$0xff] %v257_v29  ;;  %p2867_p2 = scmp.ne.s32.totalorder %s2058_s25, %s2866_s26  ;;  %p2871_p3 = scmp.lt.s32.totalorder %s2058_s25, %s2058_s25 }
 0x111   :  { %p2872_p4 = scmp.lt.s32.totalorder %s2870_s27, %s2866_s26 }
 0x113   :  { %p2873_p5 = por %p2872_p4, %p2871_p3 }
 0x115   :  { %p2874_p6 = pnand %p2873_p5, %p2867_p2 }
 0x117   :  { %v329_v2 = vld [vmem:[#allocation2] ss:$8 sm:$0xf] }
 0x121   :  { %v396_v36 = vpop.f32.mrb[0].mxu0 }
 0x122   :  { %v398_v42 = vpop.f32.mrb[1].mxu0 }
 0x123   :  { %v476_v43 = vcombine.low %v396_v36, %v398_v42 }
 0x125   :  { %v484_v54 = vrot.slane %v476_v43, %v3195_v48 }
 0x12c   :  { %v467_v49 = vpop.f32.mrb[4].mxu1 }
 0x12d   :  { %v469_v51 = vpop.f32.mrb[5].mxu1 }
 0x12e   :  { %v477_v58 = vcombine.low %v467_v49, %v469_v51 }
 0x130   :  { %v491_v60 = vrot.slane %v477_v58, %v3195_v48 }
 0x132   :  { %v492_v61 = vcombine.low %v484_v54, %v491_v60 }
 0x134   :  { %v499_v63 = vrot.slane %v492_v61, %v3195_v48 }
 0x136   :  { %v501_v5 = vadd.f32 %v499_v63, %v329_v2 }
 0x138   :  { %v2090_v6 = vmul.f32 -1.442695, %v501_v5  ;;  %v512_v8 = vrot.slane %v501_v5, 3  ;;  %v509_v4 = vrot.slane %v501_v5, 2 }
 0x139   :  { %v531_v5 = vld [vmem:[#allocation2 + $0x1] ss:$8 sm:$0xf] }
 0x13a   :  { %2710 = vpow2.f32 %v2090_v6  ;;  %v2091_v10 = vmul.f32 -1.442695, %v512_v8 }
 0x13c   :  { %2712 = vpow2.f32 %v2091_v10 }
 0x144   :  { %v2711_v11 = vpop.eup %2710 }
 0x145   :  { %v505_v12 = vadd.f32 1.0, %v2711_v11 }
 0x146   :  { %v2713_v14 = vpop.eup %2712 }
 0x147   :  { %2714 = vrcp.f32 %v505_v12  ;;  %v517_v25 = vadd.f32 1.0, %v2713_v14 }
 0x148   :  { %2716 = vtanh.f32 %v509_v4 }
 0x149   :  { %2718 = vrcp.f32 %v517_v25 }
 0x151   :  { %v2715_v17 = vpop.eup %2714 }
 0x152   :  { %v521_v20 = vrot.slane %v2715_v17, 1  ;;  %v2717_v22 = vpop.eup %2716 }
 0x153   :  { %v524_v28 = vmul.f32 %v2717_v22, %v2715_v17  ;;  %v2719_v33 = vpop.eup %2718 }
 0x154   :  { %v523_v26 = vmul.f32 %v521_v20, %v328_v18 }
 0x156   :  { %v3203_v29 = vadd.f32 %v524_v28, %v523_v26 }
 0x158   :  { %2720 = vtanh.f32 %v3203_v29 }
 0x162   :  { %v2721_v34 = vpop.eup %2720 }
 0x163   :  { %v527_v36 = vmul.f32 %v2721_v34, %v2719_v33 }
 0x165   :  { %2722 = vtanh.f32 %v527_v36  ;;  %597 = vmatmul.mubr.f32.vlgmr.msra.gmra.mrb[2].mxu0 %v527_v36  ;;  %668 = vmatmul.mubr.f32.vlgmr.msra.gmra.mrb[6].mxu1 %v527_v36 }
 0x166   :  { %2290 = vmatpush1.bf16.msra.mxu0 %v3043_v19  ;;  %2322 = vmatpush1.bf16.msra.mxu1 %v3065_v38 }
 0x167   :  { %2292 = vmatprep.subr.bf16.mxu0 %v3049_v24  ;;  %2324 = vmatprep.subr.bf16.mxu1 %v3068_v41 }
 0x168   :  { %798 = vmatprep.mubr.f32.mxu0 %v2947_v3  ;;  %869 = vmatprep.mubr.f32.mxu1 %v2947_v3 }
 0x16a   :  { %2294 = vmatpush1.bf16.msra.mxu0 %v3057_v32  ;;  %2326 = vmatpush1.bf16.msra.mxu1 %v3078_v52 }
 0x16b   :  { %2296 = vmatprep.subr.bf16.mxu0 %v3061_v35  ;;  %2328 = vmatprep.subr.bf16.mxu1 %v3082_v53 }
 0x16e   :  { %2298 = vmatpush1.bf16.msra.mxu0 %v3071_v44  ;;  %2330 = vmatpush1.bf16.msra.mxu1 %v3091_v0 }
 0x16f   :  { %v2723_v39 = vpop.eup %2722  ;;  %2300 = vmatprep.subr.bf16.mxu0 %v3074_v47  ;;  %2332 = vmatprep.subr.bf16.mxu1 %v3094_v1 }
 0x170   :  { %529 = vst [vmem:[#allocation3] sm:$0x1] %v2723_v39 }
 0x172   :  { %2302 = vmatpush1.bf16.msra.mxu0 %v3085_v57  ;;  %2334 = vmatpush1.bf16.msra.mxu1 %v3103_v15 }
 0x173   :  { %2304 = vmatprep.subr.bf16.mxu0 %v3088_v59  ;;  %2336 = vmatprep.subr.bf16.mxu1 %v3106_v16 }
 0x176   :  { %2306 = vmatpush1.bf16.msra.mxu0 %v3097_v7  ;;  %2338 = vmatpush1.bf16.msra.mxu1 %v3115_v30 }
 0x177   :  { %2308 = vmatprep.subr.bf16.mxu0 %v3100_v9  ;;  %2340 = vmatprep.subr.bf16.mxu1 %v3118_v31 }
 0x17a   :  { %2310 = vmatpush1.bf16.msra.mxu0 %v3109_v21  ;;  %2342 = vmatpush1.bf16.msra.mxu1 %v3127_v45 }
 0x17b   :  { %2312 = vmatprep.subr.bf16.mxu0 %v3112_v23  ;;  %2344 = vmatprep.subr.bf16.mxu1 %v3130_v46 }
 0x17e   :  { %2314 = vmatpush1.bf16.msra.mxu0 %v3121_v37  ;;  %2346 = vmatpush1.bf16.msra.mxu1 %v3137_v55 }
 0x17f   :  { %2316 = vmatprep.subr.bf16.mxu0 %v3124_v40  ;;  %2348 = vmatprep.subr.bf16.mxu1 %v3140_v56 }
 0x182   :  { %2318 = vmatpush1.bf16.msra.mxu0 %v3133_v50  ;;  %2350 = vmatpush1.bf16.msra.mxu1 %v3148_v62 }
 0x183   :  { %2352 = vmatprep.subr.bf16.mxu0 %v3041_v13  ;;  %2384 = vmatprep.subr.bf16.mxu1 %v3052_v27 }
 0x238   :  { %v598_v42 = vpop.f32.mrb[2].mxu0  ;;  %v669_v43 = vpop.f32.mrb[6].mxu1 }
 0x239   :  { %v600_v49 = vpop.f32.mrb[3].mxu0  ;;  %v671_v51 = vpop.f32.mrb[7].mxu1 }
 0x23a   :  { %v678_v54 = vcombine.low %v598_v42, %v600_v49  ;;  %v679_v58 = vcombine.low %v669_v43, %v671_v51 }
 0x23c   :  { %v686_v60 = vrot.slane %v678_v54, %v3195_v48  ;;  %v693_v61 = vrot.slane %v679_v58, %v3195_v48 }
 0x23e   :  { %v694_v63 = vcombine.low %v686_v60, %v693_v61 }
 0x240   :  { %v701_v2 = vrot.slane %v694_v63, %v3195_v48 }
 0x242   :  { %v703_v6 = vadd.f32 %v701_v2, %v531_v5  ;;  %v733_v5 = vld [vmem:[#allocation2 + $0x2] ss:$8 sm:$0xf] }
 0x244   :  { %v2092_v8 = vmul.f32 -1.442695, %v703_v6  ;;  %v714_v10 = vrot.slane %v703_v6, 3  ;;  %v711_v14 = vrot.slane %v703_v6, 2 }
 0x246   :  { %2724 = vpow2.f32 %v2092_v8  ;;  %v2093_v11 = vmul.f32 -1.442695, %v714_v10 }
 0x248   :  { %2726 = vpow2.f32 %v2093_v11 }
 0x250   :  { %v2725_v12 = vpop.eup %2724 }
 0x251   :  { %v707_v4 = vadd.f32 1.0, %v2725_v12 }
 0x252   :  { %v2727_v17 = vpop.eup %2726 }
 0x253   :  { %2728 = vrcp.f32 %v707_v4  ;;  %v719_v25 = vadd.f32 1.0, %v2727_v17 }
 0x254   :  { %2730 = vtanh.f32 %v711_v14 }
 0x255   :  { %2732 = vrcp.f32 %v719_v25 }
 0x25d   :  { %v2729_v18 = vpop.eup %2728 }
 0x25e   :  { %v723_v20 = vrot.slane %v2729_v18, 1  ;;  %v2731_v22 = vpop.eup %2730 }
 0x25f   :  { %v726_v28 = vmul.f32 %v2731_v22, %v2729_v18  ;;  %v2733_v34 = vpop.eup %2732 }
 0x260   :  { %v725_v26 = vmul.f32 %v723_v20, %v3203_v29 }
 0x262   :  { %v3244_v33 = vadd.f32 %v726_v28, %v725_v26 }
 0x264   :  { %2734 = vtanh.f32 %v3244_v33 }
 0x26e   :  { %v2735_v36 = vpop.eup %2734 }
 0x26f   :  { %v729_v39 = vmul.f32 %v2735_v36, %v2733_v34 }
 0x271   :  { %2736 = vtanh.f32 %v729_v39  ;;  %799 = vmatmul.mubr.f32.vlgmr.msra.gmra.mrb[4].mxu0 %v729_v39  ;;  %870 = vmatmul.mubr.f32.vlgmr.msra.gmra.mrb[8].mxu1 %v729_v39 }
 0x272   :  { %2354 = vmatpush1.bf16.msra.mxu0 %v3043_v19  ;;  %2386 = vmatpush1.bf16.msra.mxu1 %v3065_v38 }
 0x273   :  { %2356 = vmatprep.subr.bf16.mxu0 %v3049_v24  ;;  %2388 = vmatprep.subr.bf16.mxu1 %v3068_v41 }
 0x274   :  { %1000 = vmatprep.mubr.f32.mxu0 %v2947_v3  ;;  %1071 = vmatprep.mubr.f32.mxu1 %v2947_v3 }
 0x276   :  { %2358 = vmatpush1.bf16.msra.mxu0 %v3057_v32  ;;  %2390 = vmatpush1.bf16.msra.mxu1 %v3078_v52 }
 0x277   :  { %2360 = vmatprep.subr.bf16.mxu0 %v3061_v35  ;;  %2392 = vmatprep.subr.bf16.mxu1 %v3082_v53 }
 0x27a   :  { %2362 = vmatpush1.bf16.msra.mxu0 %v3071_v44  ;;  %2394 = vmatpush1.bf16.msra.mxu1 %v3091_v0 }
 0x27b   :  { %v2737_v29 = vpop.eup %2736  ;;  %2364 = vmatprep.subr.bf16.mxu0 %v3074_v47  ;;  %2396 = vmatprep.subr.bf16.mxu1 %v3094_v1 }
 0x27c   :  { %731 = vst [vmem:[#allocation3 + $0x1] sm:$0x1] %v2737_v29 }
 0x27e   :  { %2366 = vmatpush1.bf16.msra.mxu0 %v3085_v57  ;;  %2398 = vmatpush1.bf16.msra.mxu1 %v3103_v15 }
 0x27f   :  { %2368 = vmatprep.subr.bf16.mxu0 %v3088_v59  ;;  %2400 = vmatprep.subr.bf16.mxu1 %v3106_v16 }
 0x282   :  { %2370 = vmatpush1.bf16.msra.mxu0 %v3097_v7  ;;  %2402 = vmatpush1.bf16.msra.mxu1 %v3115_v30 }
 0x283   :  { %2372 = vmatprep.subr.bf16.mxu0 %v3100_v9  ;;  %2404 = vmatprep.subr.bf16.mxu1 %v3118_v31 }
 0x286   :  { %2374 = vmatpush1.bf16.msra.mxu0 %v3109_v21  ;;  %2406 = vmatpush1.bf16.msra.mxu1 %v3127_v45 }
 0x287   :  { %2376 = vmatprep.subr.bf16.mxu0 %v3112_v23  ;;  %2408 = vmatprep.subr.bf16.mxu1 %v3130_v46 }
 0x28a   :  { %2378 = vmatpush1.bf16.msra.mxu0 %v3121_v37  ;;  %2410 = vmatpush1.bf16.msra.mxu1 %v3137_v55 }
 0x28b   :  { %2380 = vmatprep.subr.bf16.mxu0 %v3124_v40  ;;  %2412 = vmatprep.subr.bf16.mxu1 %v3140_v56 }
 0x28e   :  { %2382 = vmatpush1.bf16.msra.mxu0 %v3133_v50  ;;  %2414 = vmatpush1.bf16.msra.mxu1 %v3148_v62 }
 0x28f   :  { %2416 = vmatprep.subr.bf16.mxu0 %v3041_v13  ;;  %2448 = vmatprep.subr.bf16.mxu1 %v3052_v27 }
 0x344   :  { %v800_v42 = vpop.f32.mrb[4].mxu0  ;;  %v871_v43 = vpop.f32.mrb[8].mxu1 }
 0x345   :  { %v802_v49 = vpop.f32.mrb[5].mxu0  ;;  %v873_v51 = vpop.f32.mrb[9].mxu1 }
 0x346   :  { %v880_v54 = vcombine.low %v800_v42, %v802_v49  ;;  %v881_v58 = vcombine.low %v871_v43, %v873_v51 }
 0x348   :  { %v888_v60 = vrot.slane %v880_v54, %v3195_v48  ;;  %v895_v61 = vrot.slane %v881_v58, %v3195_v48 }
 0x34a   :  { %v896_v63 = vcombine.low %v888_v60, %v895_v61 }
 0x34c   :  { %v903_v2 = vrot.slane %v896_v63, %v3195_v48 }
 0x34e   :  { %v905_v6 = vadd.f32 %v903_v2, %v733_v5  ;;  %v935_v5 = vld [vmem:[#allocation2 + $0x3] ss:$8 sm:$0xf] }
 0x350   :  { %v2094_v8 = vmul.f32 -1.442695, %v905_v6  ;;  %v916_v10 = vrot.slane %v905_v6, 3  ;;  %v913_v14 = vrot.slane %v905_v6, 2 }
 0x352   :  { %2738 = vpow2.f32 %v2094_v8  ;;  %v2095_v11 = vmul.f32 -1.442695, %v916_v10 }
 0x354   :  { %2740 = vpow2.f32 %v2095_v11 }
 0x35c   :  { %v2739_v12 = vpop.eup %2738 }
 0x35d   :  { %v909_v4 = vadd.f32 1.0, %v2739_v12 }
 0x35e   :  { %v2741_v17 = vpop.eup %2740 }
 0x35f   :  { %2742 = vrcp.f32 %v909_v4  ;;  %v921_v25 = vadd.f32 1.0, %v2741_v17 }
 0x360   :  { %2744 = vtanh.f32 %v913_v14 }
 0x361   :  { %2746 = vrcp.f32 %v921_v25 }
 0x369   :  { %v2743_v18 = vpop.eup %2742 }
 0x36a   :  { %v925_v20 = vrot.slane %v2743_v18, 1  ;;  %v2745_v22 = vpop.eup %2744 }
 0x36b   :  { %v928_v28 = vmul.f32 %v2745_v22, %v2743_v18  ;;  %v2747_v36 = vpop.eup %2746 }
 0x36c   :  { %v927_v26 = vmul.f32 %v925_v20, %v3244_v33 }
 0x36e   :  { %v3285_v34 = vadd.f32 %v928_v28, %v927_v26 }
 0x370   :  { %2748 = vtanh.f32 %v3285_v34 }
 0x37a   :  { %v2749_v39 = vpop.eup %2748 }
 0x37b   :  { %v931_v29 = vmul.f32 %v2749_v39, %v2747_v36 }
 0x37d   :  { %2750 = vtanh.f32 %v931_v29  ;;  %1001 = vmatmul.mubr.f32.vlgmr.msra.gmra.mrb[6].mxu0 %v931_v29  ;;  %1072 = vmatmul.mubr.f32.vlgmr.msra.gmra.mrb[10].mxu1 %v931_v29 }
 0x37e   :  { %2418 = vmatpush1.bf16.msra.mxu0 %v3043_v19  ;;  %2450 = vmatpush1.bf16.msra.mxu1 %v3065_v38 }
 0x37f   :  { %2420 = vmatprep.subr.bf16.mxu0 %v3049_v24  ;;  %2452 = vmatprep.subr.bf16.mxu1 %v3068_v41 }
 0x380   :  { %1202 = vmatprep.mubr.f32.mxu0 %v2947_v3  ;;  %1273 = vmatprep.mubr.f32.mxu1 %v2947_v3 }
 0x382   :  { %2422 = vmatpush1.bf16.msra.mxu0 %v3057_v32  ;;  %2454 = vmatpush1.bf16.msra.mxu1 %v3078_v52 }
 0x383   :  { %2424 = vmatprep.subr.bf16.mxu0 %v3061_v35  ;;  %2456 = vmatprep.subr.bf16.mxu1 %v3082_v53 }
 0x386   :  { %2426 = vmatpush1.bf16.msra.mxu0 %v3071_v44  ;;  %2458 = vmatpush1.bf16.msra.mxu1 %v3091_v0 }
 0x387   :  { %v2751_v33 = vpop.eup %2750  ;;  %2428 = vmatprep.subr.bf16.mxu0 %v3074_v47  ;;  %2460 = vmatprep.subr.bf16.mxu1 %v3094_v1 }
 0x388   :  { %933 = vst [vmem:[#allocation3 + $0x2] sm:$0x1] %v2751_v33 }
 0x38a   :  { %2430 = vmatpush1.bf16.msra.mxu0 %v3085_v57  ;;  %2462 = vmatpush1.bf16.msra.mxu1 %v3103_v15 }
 0x38b   :  { %2432 = vmatprep.subr.bf16.mxu0 %v3088_v59  ;;  %2464 = vmatprep.subr.bf16.mxu1 %v3106_v16 }
 0x38e   :  { %2434 = vmatpush1.bf16.msra.mxu0 %v3097_v7  ;;  %2466 = vmatpush1.bf16.msra.mxu1 %v3115_v30 }
 0x38f   :  { %2436 = vmatprep.subr.bf16.mxu0 %v3100_v9  ;;  %2468 = vmatprep.subr.bf16.mxu1 %v3118_v31 }
 0x392   :  { %2438 = vmatpush1.bf16.msra.mxu0 %v3109_v21  ;;  %2470 = vmatpush1.bf16.msra.mxu1 %v3127_v45 }
 0x393   :  { %2440 = vmatprep.subr.bf16.mxu0 %v3112_v23  ;;  %2472 = vmatprep.subr.bf16.mxu1 %v3130_v46 }
 0x396   :  { %2442 = vmatpush1.bf16.msra.mxu0 %v3121_v37  ;;  %2474 = vmatpush1.bf16.msra.mxu1 %v3137_v55 }
 0x397   :  { %2444 = vmatprep.subr.bf16.mxu0 %v3124_v40  ;;  %2476 = vmatprep.subr.bf16.mxu1 %v3140_v56 }
 0x39a   :  { %2446 = vmatpush1.bf16.msra.mxu0 %v3133_v50  ;;  %2478 = vmatpush1.bf16.msra.mxu1 %v3148_v62 }
 0x39b   :  { %2480 = vmatprep.subr.bf16.mxu0 %v3041_v13  ;;  %2512 = vmatprep.subr.bf16.mxu1 %v3052_v27 }
 0x450   :  { %v1002_v42 = vpop.f32.mrb[6].mxu0  ;;  %v1073_v43 = vpop.f32.mrb[10].mxu1 }
 0x451   :  { %v1004_v49 = vpop.f32.mrb[7].mxu0  ;;  %v1075_v51 = vpop.f32.mrb[11].mxu1 }
 0x452   :  { %v1082_v54 = vcombine.low %v1002_v42, %v1004_v49  ;;  %v1083_v58 = vcombine.low %v1073_v43, %v1075_v51 }
 0x454   :  { %v1090_v60 = vrot.slane %v1082_v54, %v3195_v48  ;;  %v1097_v61 = vrot.slane %v1083_v58, %v3195_v48 }
 0x456   :  { %v1098_v63 = vcombine.low %v1090_v60, %v1097_v61 }
 0x458   :  { %v1105_v2 = vrot.slane %v1098_v63, %v3195_v48 }
 0x45a   :  { %v1107_v6 = vadd.f32 %v1105_v2, %v935_v5  ;;  %v1137_v5 = vld [vmem:[#allocation2 + $0x4] ss:$8 sm:$0xf] }
 0x45c   :  { %v2096_v8 = vmul.f32 -1.442695, %v1107_v6  ;;  %v1118_v10 = vrot.slane %v1107_v6, 3  ;;  %v1115_v14 = vrot.slane %v1107_v6, 2 }
 0x45e   :  { %2752 = vpow2.f32 %v2096_v8  ;;  %v2097_v11 = vmul.f32 -1.442695, %v1118_v10 }
 0x460   :  { %2754 = vpow2.f32 %v2097_v11 }
 0x468   :  { %v2753_v12 = vpop.eup %2752 }
 0x469   :  { %v1111_v4 = vadd.f32 1.0, %v2753_v12 }
 0x46a   :  { %v2755_v17 = vpop.eup %2754 }
 0x46b   :  { %2756 = vrcp.f32 %v1111_v4  ;;  %v1123_v25 = vadd.f32 1.0, %v2755_v17 }
 0x46c   :  { %2758 = vtanh.f32 %v1115_v14 }
 0x46d   :  { %2760 = vrcp.f32 %v1123_v25 }
 0x475   :  { %v2757_v18 = vpop.eup %2756 }
 0x476   :  { %v1127_v20 = vrot.slane %v2757_v18, 1  ;;  %v2759_v22 = vpop.eup %2758 }
 0x477   :  { %v1130_v28 = vmul.f32 %v2759_v22, %v2757_v18  ;;  %v2761_v39 = vpop.eup %2760 }
 0x478   :  { %v1129_v26 = vmul.f32 %v1127_v20, %v3285_v34 }
 0x47a   :  { %v3326_v36 = vadd.f32 %v1130_v28, %v1129_v26 }
 0x47c   :  { %2762 = vtanh.f32 %v3326_v36 }
 0x486   :  { %v2763_v29 = vpop.eup %2762 }
 0x487   :  { %v1133_v33 = vmul.f32 %v2763_v29, %v2761_v39 }
 0x489   :  { %2764 = vtanh.f32 %v1133_v33  ;;  %1203 = vmatmul.mubr.f32.vlgmr.msra.gmra.mrb[8].mxu0 %v1133_v33  ;;  %1274 = vmatmul.mubr.f32.vlgmr.msra.gmra.mrb[12].mxu1 %v1133_v33 }
 0x48a   :  { %2482 = vmatpush1.bf16.msra.mxu0 %v3043_v19  ;;  %2514 = vmatpush1.bf16.msra.mxu1 %v3065_v38 }
 0x48b   :  { %2484 = vmatprep.subr.bf16.mxu0 %v3049_v24  ;;  %2516 = vmatprep.subr.bf16.mxu1 %v3068_v41 }
 0x48c   :  { %1404 = vmatprep.mubr.f32.mxu0 %v2947_v3  ;;  %1475 = vmatprep.mubr.f32.mxu1 %v2947_v3 }
 0x48e   :  { %2486 = vmatpush1.bf16.msra.mxu0 %v3057_v32  ;;  %2518 = vmatpush1.bf16.msra.mxu1 %v3078_v52 }
 0x48f   :  { %2488 = vmatprep.subr.bf16.mxu0 %v3061_v35  ;;  %2520 = vmatprep.subr.bf16.mxu1 %v3082_v53 }
 0x492   :  { %2490 = vmatpush1.bf16.msra.mxu0 %v3071_v44  ;;  %2522 = vmatpush1.bf16.msra.mxu1 %v3091_v0 }
 0x493   :  { %v2765_v34 = vpop.eup %2764  ;;  %2492 = vmatprep.subr.bf16.mxu0 %v3074_v47  ;;  %2524 = vmatprep.subr.bf16.mxu1 %v3094_v1 }
 0x494   :  { %1135 = vst [vmem:[#allocation3 + $0x3] sm:$0x1] %v2765_v34 }
 0x496   :  { %2494 = vmatpush1.bf16.msra.mxu0 %v3085_v57  ;;  %2526 = vmatpush1.bf16.msra.mxu1 %v3103_v15 }
 0x497   :  { %2496 = vmatprep.subr.bf16.mxu0 %v3088_v59  ;;  %2528 = vmatprep.subr.bf16.mxu1 %v3106_v16 }
 0x49a   :  { %2498 = vmatpush1.bf16.msra.mxu0 %v3097_v7  ;;  %2530 = vmatpush1.bf16.msra.mxu1 %v3115_v30 }
 0x49b   :  { %2500 = vmatprep.subr.bf16.mxu0 %v3100_v9  ;;  %2532 = vmatprep.subr.bf16.mxu1 %v3118_v31 }
 0x49e   :  { %2502 = vmatpush1.bf16.msra.mxu0 %v3109_v21  ;;  %2534 = vmatpush1.bf16.msra.mxu1 %v3127_v45 }
 0x49f   :  { %2504 = vmatprep.subr.bf16.mxu0 %v3112_v23  ;;  %2536 = vmatprep.subr.bf16.mxu1 %v3130_v46 }
 0x4a2   :  { %2506 = vmatpush1.bf16.msra.mxu0 %v3121_v37  ;;  %2538 = vmatpush1.bf16.msra.mxu1 %v3137_v55 }
 0x4a3   :  { %2508 = vmatprep.subr.bf16.mxu0 %v3124_v40  ;;  %2540 = vmatprep.subr.bf16.mxu1 %v3140_v56 }
 0x4a6   :  { %2510 = vmatpush1.bf16.msra.mxu0 %v3133_v50  ;;  %2542 = vmatpush1.bf16.msra.mxu1 %v3148_v62 }
 0x4a7   :  { %2544 = vmatprep.subr.bf16.mxu0 %v3041_v13  ;;  %2576 = vmatprep.subr.bf16.mxu1 %v3052_v27 }
 0x55c   :  { %v1204_v42 = vpop.f32.mrb[8].mxu0  ;;  %v1275_v43 = vpop.f32.mrb[12].mxu1 }
 0x55d   :  { %v1206_v49 = vpop.f32.mrb[9].mxu0  ;;  %v1277_v51 = vpop.f32.mrb[13].mxu1 }
 0x55e   :  { %v1284_v54 = vcombine.low %v1204_v42, %v1206_v49  ;;  %v1285_v58 = vcombine.low %v1275_v43, %v1277_v51 }
 0x560   :  { %v1292_v60 = vrot.slane %v1284_v54, %v3195_v48  ;;  %v1299_v61 = vrot.slane %v1285_v58, %v3195_v48 }
 0x562   :  { %v1300_v63 = vcombine.low %v1292_v60, %v1299_v61 }
 0x564   :  { %v1307_v2 = vrot.slane %v1300_v63, %v3195_v48 }
 0x566   :  { %v1309_v6 = vadd.f32 %v1307_v2, %v1137_v5  ;;  %v1339_v5 = vld [vmem:[#allocation2 + $0x5] ss:$8 sm:$0xf] }
 0x568   :  { %v2098_v8 = vmul.f32 -1.442695, %v1309_v6  ;;  %v1320_v10 = vrot.slane %v1309_v6, 3  ;;  %v1317_v14 = vrot.slane %v1309_v6, 2 }
 0x56a   :  { %2766 = vpow2.f32 %v2098_v8  ;;  %v2099_v11 = vmul.f32 -1.442695, %v1320_v10 }
 0x56c   :  { %2768 = vpow2.f32 %v2099_v11 }
 0x574   :  { %v2767_v12 = vpop.eup %2766 }
 0x575   :  { %v1313_v4 = vadd.f32 1.0, %v2767_v12 }
 0x576   :  { %v2769_v17 = vpop.eup %2768 }
 0x577   :  { %2770 = vrcp.f32 %v1313_v4  ;;  %v1325_v25 = vadd.f32 1.0, %v2769_v17 }
 0x578   :  { %2772 = vtanh.f32 %v1317_v14 }
 0x579   :  { %2774 = vrcp.f32 %v1325_v25 }
 0x581   :  { %v2771_v18 = vpop.eup %2770 }
 0x582   :  { %v1329_v20 = vrot.slane %v2771_v18, 1  ;;  %v2773_v22 = vpop.eup %2772 }
 0x583   :  { %v1332_v28 = vmul.f32 %v2773_v22, %v2771_v18  ;;  %v2775_v29 = vpop.eup %2774 }
 0x584   :  { %v1331_v26 = vmul.f32 %v1329_v20, %v3326_v36 }
 0x586   :  { %v3367_v39 = vadd.f32 %v1332_v28, %v1331_v26 }
 0x588   :  { %2776 = vtanh.f32 %v3367_v39 }
 0x592   :  { %v2777_v33 = vpop.eup %2776 }
 0x593   :  { %v1335_v34 = vmul.f32 %v2777_v33, %v2775_v29 }
 0x595   :  { %2778 = vtanh.f32 %v1335_v34  ;;  %1405 = vmatmul.mubr.f32.vlgmr.msra.gmra.mrb[10].mxu0 %v1335_v34  ;;  %1476 = vmatmul.mubr.f32.vlgmr.msra.gmra.mrb[14].mxu1 %v1335_v34  ;;  %v1945_v34 = vld [vmem:[#allocation7] sm:$0xff] }
 0x596   :  { %2546 = vmatpush1.bf16.msra.mxu0 %v3043_v19  ;;  %2578 = vmatpush1.bf16.msra.mxu1 %v3065_v38 }
 0x597   :  { %2548 = vmatprep.subr.bf16.mxu0 %v3049_v24  ;;  %2580 = vmatprep.subr.bf16.mxu1 %v3068_v41 }
 0x598   :  { %1606 = vmatprep.mubr.f32.mxu0 %v2947_v3  ;;  %1677 = vmatprep.mubr.f32.mxu1 %v2947_v3 }
 0x59a   :  { %2550 = vmatpush1.bf16.msra.mxu0 %v3057_v32  ;;  %2582 = vmatpush1.bf16.msra.mxu1 %v3078_v52 }
 0x59b   :  { %2552 = vmatprep.subr.bf16.mxu0 %v3061_v35  ;;  %2584 = vmatprep.subr.bf16.mxu1 %v3082_v53 }
 0x59e   :  { %2554 = vmatpush1.bf16.msra.mxu0 %v3071_v44  ;;  %2586 = vmatpush1.bf16.msra.mxu1 %v3091_v0 }
 0x59f   :  { %v2779_v36 = vpop.eup %2778  ;;  %2556 = vmatprep.subr.bf16.mxu0 %v3074_v47  ;;  %2588 = vmatprep.subr.bf16.mxu1 %v3094_v1 }
 0x5a0   :  { %1337 = vst [vmem:[#allocation3 + $0x4] sm:$0x1] %v2779_v36  ;;  %v1946_v36 = vld [vmem:[#allocation7 + $0x8] sm:$0xff] }
 0x5a2   :  { %2558 = vmatpush1.bf16.msra.mxu0 %v3085_v57  ;;  %2590 = vmatpush1.bf16.msra.mxu1 %v3103_v15 }
 0x5a3   :  { %2560 = vmatprep.subr.bf16.mxu0 %v3088_v59  ;;  %2592 = vmatprep.subr.bf16.mxu1 %v3106_v16 }
 0x5a6   :  { %2562 = vmatpush1.bf16.msra.mxu0 %v3097_v7  ;;  %2594 = vmatpush1.bf16.msra.mxu1 %v3115_v30 }
 0x5a7   :  { %2564 = vmatprep.subr.bf16.mxu0 %v3100_v9  ;;  %2596 = vmatprep.subr.bf16.mxu1 %v3118_v31 }
 0x5aa   :  { %2566 = vmatpush1.bf16.msra.mxu0 %v3109_v21  ;;  %2598 = vmatpush1.bf16.msra.mxu1 %v3127_v45 }
 0x5ab   :  { %2568 = vmatprep.subr.bf16.mxu0 %v3112_v23  ;;  %2600 = vmatprep.subr.bf16.mxu1 %v3130_v46 }
 0x5ae   :  { %2570 = vmatpush1.bf16.msra.mxu0 %v3121_v37  ;;  %2602 = vmatpush1.bf16.msra.mxu1 %v3137_v55 }
 0x5af   :  { %2572 = vmatprep.subr.bf16.mxu0 %v3124_v40  ;;  %2604 = vmatprep.subr.bf16.mxu1 %v3140_v56 }
 0x5b2   :  { %2574 = vmatpush1.bf16.msra.mxu0 %v3133_v50  ;;  %2606 = vmatpush1.bf16.msra.mxu1 %v3148_v62 }
 0x5b3   :  { %2608 = vmatprep.subr.bf16.mxu0 %v3041_v13  ;;  %2640 = vmatprep.subr.bf16.mxu1 %v3052_v27 }
 0x668   :  { %v1406_v42 = vpop.f32.mrb[10].mxu0  ;;  %v1477_v43 = vpop.f32.mrb[14].mxu1 }
 0x669   :  { %v1408_v49 = vpop.f32.mrb[11].mxu0  ;;  %v1479_v51 = vpop.f32.mrb[15].mxu1 }
 0x66a   :  { %v1486_v54 = vcombine.low %v1406_v42, %v1408_v49  ;;  %v1487_v58 = vcombine.low %v1477_v43, %v1479_v51  ;;  %v2672_v42 = vpack.c.bf16 %v1946_v36, %v1945_v34  ;;  %v2949_v43 = vmov 0.0|0.0   ;;  %v1947_v49 = vld [vmem:[#allocation7 + $0x10] sm:$0xff]  ;;  %v1948_v51 = vld [vmem:[#allocation7 + $0x18] sm:$0xff] }
 0x66c   :  { %v1494_v60 = vrot.slane %v1486_v54, %v3195_v48  ;;  %v1501_v61 = vrot.slane %v1487_v58, %v3195_v48  ;;  %v2675_v54 = vpack.c.bf16 %v1948_v51, %v1947_v49  ;;  %v1949_v58 = vld [vmem:[#allocation7 + $0x20] sm:$0xff] }
 0x66e   :  { %v1502_v63 = vcombine.low %v1494_v60, %v1501_v61  ;;  %v1950_v60 = vld [vmem:[#allocation7 + $0x28] sm:$0xff] }
 0x66f   :  { %v2678_v61 = vpack.c.bf16 %v1950_v60, %v1949_v58 }
 0x670   :  { %v1509_v2 = vrot.slane %v1502_v63, %v3195_v48  ;;  %v1951_v63 = vld [vmem:[#allocation7 + $0x30] sm:$0xff] }
 0x672   :  { %v1511_v6 = vadd.f32 %v1509_v2, %v1339_v5  ;;  %v1952_v2 = vld [vmem:[#allocation7 + $0x38] sm:$0xff] }
 0x673   :  { %v2681_v5 = vpack.c.bf16 %v1952_v2, %v1951_v63 }
 0x674   :  { %v2100_v8 = vmul.f32 -1.442695, %v1511_v6  ;;  %v1522_v13 = vrot.slane %v1511_v6, 3  ;;  %v1519_v12 = vrot.slane %v1511_v6, 2  ;;  %v1953_v6 = vld [vmem:[#allocation7 + $0x40] sm:$0xff] }
 0x676   :  { %2780 = vpow2.f32 %v2100_v8  ;;  %v2101_v10 = vmul.f32 -1.442695, %v1522_v13  ;;  %v1954_v8 = vld [vmem:[#allocation7 + $0x48] sm:$0xff] }
 0x677   :  { %v2684_v13 = vpack.c.bf16 %v1954_v8, %v1953_v6 }
 0x678   :  { %2782 = vpow2.f32 %v2101_v10  ;;  %v1955_v10 = vld [vmem:[#allocation7 + $0x50] sm:$0xff] }
 0x680   :  { %v2781_v27 = vpop.eup %2780 }
 0x681   :  { %v1515_v11 = vadd.f32 1.0, %v2781_v27  ;;  %v1956_v27 = vld [vmem:[#allocation7 + $0x58] sm:$0xff] }
 0x682   :  { %v2783_v4 = vpop.eup %2782 }
 0x683   :  { %2784 = vrcp.f32 %v1515_v11  ;;  %v1527_v20 = vadd.f32 1.0, %v2783_v4  ;;  %v2687_v11 = vpack.c.bf16 %v1956_v27, %v1955_v10  ;;  %v1958_v4 = vld [vmem:[#allocation7 + $0x68] sm:$0xff] }
 0x684   :  { %2786 = vtanh.f32 %v1519_v12  ;;  %v1957_v12 = vld [vmem:[#allocation7 + $0x60] sm:$0xff] }
 0x685   :  { %2788 = vrcp.f32 %v1527_v20 }
 0x68d   :  { %v2785_v14 = vpop.eup %2784 }
 0x68e   :  { %v1531_v17 = vrot.slane %v2785_v14, 1  ;;  %v2787_v18 = vpop.eup %2786 }
 0x68f   :  { %v1534_v25 = vmul.f32 %v2787_v18, %v2785_v14  ;;  %v2789_v28 = vpop.eup %2788  ;;  %v1959_v14 = vld [vmem:[#allocation7 + $0x70] sm:$0xff]  ;;  %v1960_v18 = vld [vmem:[#allocation7 + $0x78] sm:$0xff] }
 0x690   :  { %v1533_v22 = vmul.f32 %v1531_v17, %v3367_v39  ;;  %v2690_v17 = vpack.c.bf16 %v1958_v4, %v1957_v12  ;;  %v2693_v20 = vpack.c.bf16 %v1960_v18, %v1959_v14 }
 0x692   :  { %v3408_v26 = vadd.f32 %v1534_v25, %v1533_v22 }
 0x694   :  { %2790 = vtanh.f32 %v3408_v26 }
 0x69e   :  { %v2791_v29 = vpop.eup %2790 }
 0x69f   :  { %v1537_v33 = vmul.f32 %v2791_v29, %v2789_v28 }
 0x6a1   :  { %2792 = vtanh.f32 %v1537_v33  ;;  %1607 = vmatmul.mubr.f32.vlgmr.msra.gmra.mrb[12].mxu0 %v1537_v33  ;;  %1678 = vmatmul.mubr.f32.vlgmr.msra.gmra.mrb[16].mxu1 %v1537_v33 }
 0x6a2   :  { %2610 = vmatpush1.bf16.msra.mxu0 %v3043_v19  ;;  %2642 = vmatpush1.bf16.msra.mxu1 %v3065_v38 }
 0x6a3   :  { %2612 = vmatprep.subr.bf16.mxu0 %v3049_v24  ;;  %2644 = vmatprep.subr.bf16.mxu1 %v3068_v41 }
 0x6a4   :  { %1808 = vmatprep.mubr.f32.mxu0 %v2947_v3  ;;  %1879 = vmatprep.mubr.f32.mxu1 %v2947_v3 }
 0x6a6   :  { %2614 = vmatpush1.bf16.msra.mxu0 %v3057_v32  ;;  %2646 = vmatpush1.bf16.msra.mxu1 %v3078_v52 }
 0x6a7   :  { %2616 = vmatprep.subr.bf16.mxu0 %v3061_v35  ;;  %2648 = vmatprep.subr.bf16.mxu1 %v3082_v53 }
 0x6aa   :  { %2618 = vmatpush1.bf16.msra.mxu0 %v3071_v44  ;;  %2650 = vmatpush1.bf16.msra.mxu1 %v3091_v0 }
 0x6ab   :  { %v2793_v19 = vpop.eup %2792  ;;  %2620 = vmatprep.subr.bf16.mxu0 %v3074_v47  ;;  %2652 = vmatprep.subr.bf16.mxu1 %v3094_v1 }
 0x6ac   :  { %1539 = vst [vmem:[#allocation3 + $0x5] sm:$0x1] %v2793_v19 }
 0x6ae   :  { %2622 = vmatpush1.bf16.msra.mxu0 %v3085_v57  ;;  %2654 = vmatpush1.bf16.msra.mxu1 %v3103_v15 }
 0x6af   :  { %2624 = vmatprep.subr.bf16.mxu0 %v3088_v59  ;;  %2656 = vmatprep.subr.bf16.mxu1 %v3106_v16  ;;  %v1541_v59 = vld [vmem:[#allocation2 + $0x6] ss:$8 sm:$0xf] }
 0x6b2   :  { %2626 = vmatpush1.bf16.msra.mxu0 %v3097_v7  ;;  %2658 = vmatpush1.bf16.msra.mxu1 %v3115_v30 }
 0x6b3   :  { %2628 = vmatprep.subr.bf16.mxu0 %v3100_v9  ;;  %2660 = vmatprep.subr.bf16.mxu1 %v3118_v31 }
 0x6b6   :  { %2630 = vmatpush1.bf16.msra.mxu0 %v3109_v21  ;;  %2662 = vmatpush1.bf16.msra.mxu1 %v3127_v45 }
 0x6b7   :  { %2632 = vmatprep.subr.bf16.mxu0 %v3112_v23  ;;  %2664 = vmatprep.subr.bf16.mxu1 %v3130_v46 }
 0x6ba   :  { %2634 = vmatpush1.bf16.msra.mxu0 %v3121_v37  ;;  %2666 = vmatpush1.bf16.msra.mxu1 %v3137_v55 }
 0x6bb   :  { %2636 = vmatprep.subr.bf16.mxu0 %v3124_v40  ;;  %2668 = vmatprep.subr.bf16.mxu1 %v3140_v56 }
 0x6be   :  { %2638 = vmatpush1.bf16.msra.mxu0 %v3133_v50  ;;  %2670 = vmatpush1.bf16.msra.mxu1 %v3148_v62 }
 0x6bf   :  { %2671 = vmatprep.subr.bf16.mxu0 %v2949_v43 }
 0x774   :  { %v1608_v24 = vpop.f32.mrb[12].mxu0  ;;  %v1679_v32 = vpop.f32.mrb[16].mxu1 }
 0x775   :  { %v1610_v35 = vpop.f32.mrb[13].mxu0  ;;  %v1681_v38 = vpop.f32.mrb[17].mxu1 }
 0x776   :  { %v1688_v41 = vcombine.low %v1608_v24, %v1610_v35  ;;  %v1689_v44 = vcombine.low %v1679_v32, %v1681_v38  ;;  %v1743_v38 = vld [vmem:[#allocation2 + $0x7] ss:$8 sm:$0xf] }
 0x778   :  { %v1696_v47 = vrot.slane %v1688_v41, %v3195_v48  ;;  %v1703_v52 = vrot.slane %v1689_v44, %v3195_v48 }
 0x77a   :  { %v1704_v53 = vcombine.low %v1696_v47, %v1703_v52 }
 0x77c   :  { %v1711_v57 = vrot.slane %v1704_v53, %v3195_v48 }
 0x77e   :  { %v1713_v0 = vadd.f32 %v1711_v57, %v1541_v59 }
 0x780   :  { %v2102_v1 = vmul.f32 -1.442695, %v1713_v0  ;;  %v1724_v7 = vrot.slane %v1713_v0, 3  ;;  %v1721_v21 = vrot.slane %v1713_v0, 2 }
 0x782   :  { %2794 = vpow2.f32 %v2102_v1  ;;  %v2103_v9 = vmul.f32 -1.442695, %v1724_v7 }
 0x784   :  { %2796 = vpow2.f32 %v2103_v9 }
 0x78c   :  { %v2795_v15 = vpop.eup %2794 }
 0x78d   :  { %v1717_v16 = vadd.f32 1.0, %v2795_v15 }
 0x78e   :  { %v2797_v23 = vpop.eup %2796 }
 0x78f   :  { %2798 = vrcp.f32 %v1717_v16  ;;  %v1729_v40 = vadd.f32 1.0, %v2797_v23 }
 0x790   :  { %2800 = vtanh.f32 %v1721_v21 }
 0x791   :  { %2802 = vrcp.f32 %v1729_v40 }
 0x799   :  { %v2799_v30 = vpop.eup %2798 }
 0x79a   :  { %v1733_v31 = vrot.slane %v2799_v30, 1  ;;  %v2801_v37 = vpop.eup %2800 }
 0x79b   :  { %v1736_v46 = vmul.f32 %v2801_v37, %v2799_v30  ;;  %v2803_v55 = vpop.eup %2802 }
 0x79c   :  { %v1735_v45 = vmul.f32 %v1733_v31, %v3408_v26 }
 0x79e   :  { %v3447_v50 = vadd.f32 %v1736_v46, %v1735_v45 }
 0x7a0   :  { %2804 = vtanh.f32 %v3447_v50 }
 0x7aa   :  { %v2805_v56 = vpop.eup %2804 }
 0x7ab   :  { %v1739_v62 = vmul.f32 %v2805_v56, %v2803_v55 }
 0x7ad   :  { %2806 = vtanh.f32 %v1739_v62  ;;  %1809 = vmatmul.mubr.f32.vlgmr.msra.gmra.mrb[14].mxu0 %v1739_v62  ;;  %1880 = vmatmul.mubr.f32.vlgmr.msra.gmra.mrb[18].mxu1 %v1739_v62 }
 0x7ae   :  { %2673 = vmatpush3.bf16.msra.mxu0 %v2672_v42  ;;  %2156 = vmatprep.mubr.msk.f32.mxu0 %vm2950_vm2, %v2947_v3 }
 0x7af   :  { %2674 = vmatprep.subr.bf16.mxu0 %v2949_v43 }
 0x7b2   :  { %2676 = vmatpush3.bf16.msra.mxu0 %v2675_v54 }
 0x7b3   :  { %2677 = vmatprep.subr.bf16.mxu0 %v2949_v43 }
 0x7b6   :  { %2679 = vmatpush3.bf16.msra.mxu0 %v2678_v61 }
 0x7b7   :  { %v2807_v39 = vpop.eup %2806  ;;  %2680 = vmatprep.subr.bf16.mxu0 %v2949_v43 }
 0x7b8   :  { %1741 = vst [vmem:[#allocation3 + $0x6] sm:$0x1] %v2807_v39 }
 0x7ba   :  { %2682 = vmatpush3.bf16.msra.mxu0 %v2681_v5 }
 0x7bb   :  { %2683 = vmatprep.subr.bf16.mxu0 %v2949_v43 }
 0x7be   :  { %2685 = vmatpush3.bf16.msra.mxu0 %v2684_v13 }
 0x7bf   :  { %2686 = vmatprep.subr.bf16.mxu0 %v2949_v43 }
 0x7c2   :  { %2688 = vmatpush3.bf16.msra.mxu0 %v2687_v11 }
 0x7c3   :  { %2689 = vmatprep.subr.bf16.mxu0 %v2949_v43 }
 0x7c6   :  { %2691 = vmatpush3.bf16.msra.mxu0 %v2690_v17 }
 0x7c7   :  { %2692 = vmatprep.subr.bf16.mxu0 %v2949_v43 }
 0x7ca   :  { %2694 = vmatpush3.bf16.msra.mxu0 %v2693_v20 }
 0x880   :  { %v1810_v22 = vpop.f32.mrb[14].mxu0  ;;  %v1881_v25 = vpop.f32.mrb[18].mxu1 }
 0x881   :  { %v1812_v26 = vpop.f32.mrb[15].mxu0  ;;  %v1883_v28 = vpop.f32.mrb[19].mxu1 }
 0x882   :  { %v1890_v29 = vcombine.low %v1810_v22, %v1812_v26  ;;  %v1891_v33 = vcombine.low %v1881_v25, %v1883_v28 }
 0x884   :  { %v1898_v19 = vrot.slane %v1890_v29, %v3195_v48  ;;  %v1905_v24 = vrot.slane %v1891_v33, %v3195_v48 }
 0x886   :  { %v1906_v32 = vcombine.low %v1898_v19, %v1905_v24 }
 0x888   :  { %v1913_v35 = vrot.slane %v1906_v32, %v3195_v48 }
 0x88a   :  { %v1915_v41 = vadd.f32 %v1913_v35, %v1743_v38 }
 0x88c   :  { %v2104_v3 = vmul.f32 -1.442695, %v1915_v41  ;;  %v1926_v44 = vrot.slane %v1915_v41, 3  ;;  %v1923_v57 = vrot.slane %v1915_v41, 2 }
 0x88e   :  { %2808 = vpow2.f32 %v2104_v3  ;;  %v2105_v47 = vmul.f32 -1.442695, %v1926_v44 }
 0x890   :  { %2810 = vpow2.f32 %v2105_v47 }
 0x898   :  { %v2809_v52 = vpop.eup %2808 }
 0x899   :  { %v1919_v53 = vadd.f32 1.0, %v2809_v52 }
 0x89a   :  { %v2811_v59 = vpop.eup %2810 }
 0x89b   :  { %2812 = vrcp.f32 %v1919_v53  ;;  %v1931_v9 = vadd.f32 1.0, %v2811_v59 }
 0x89c   :  { %2814 = vtanh.f32 %v1923_v57 }
 0x89d   :  { %2816 = vrcp.f32 %v1931_v9 }
 0x8a5   :  { %v2813_v0 = vpop.eup %2812 }
 0x8a6   :  { %v1935_v1 = vrot.slane %v2813_v0, 1  ;;  %v2815_v7 = vpop.eup %2814 }
 0x8a7   :  { %v1938_v48 = vmul.f32 %v2815_v7, %v2813_v0  ;;  %v2817_v21 = vpop.eup %2816 }
 0x8a8   :  { %v1937_v15 = vmul.f32 %v1935_v1, %v3447_v50 }
 0x8aa   :  { %v1939_v16 = vadd.f32 %v1938_v48, %v1937_v15 }
 0x8ac   :  { %2818 = vtanh.f32 %v1939_v16  ;;  %2040 = vst [vmem:[#allocation12] sm:$0x1] %v1939_v16 }
 0x8b6   :  { %v2819_v23 = vpop.eup %2818 }
 0x8b7   :  { %v1941_v30 = vmul.f32 %v2819_v23, %v2817_v21 }
 0x8b9   :  { %2820 = vtanh.f32 %v1941_v30  ;;  %2039 = vst [vmem:[#allocation10] sm:$0x1] %v1941_v30 }
 0x8c3   :  { %v2821_v31 = vpop.eup %2820 }
 0x8c4   :  { %1943 = vst [vmem:[#allocation3 + $0x7] sm:$0x1] %v2821_v31 }
 0x8cb   :  { %v1944_v37 = vld [vmem:[#allocation3] sm:$0xff] }
 0x8cc   :  { %2157 = vmatmul.mubr.f32.vlgmr.msra.gmra.mrb[16].mxu0 %v1944_v37 }
 0x8cd   :  { %2877 = shalt.err (!%p2874_p6)
}
 0x8ce   :  { %s2878_s30 = scalar_lea.hbm %s3503_s9, 16 }
 0x8cf   :  { %p2879_p7 = scmp.ne.s32.totalorder %s3503_s9, %s2878_s30  ;;  %p2882_p8 = scmp.lt.u32.totalorder %s2878_s30, %s3503_s9 }
 0x8d1   :  { %p2884_p9 = pnand %p2882_p8, %p2879_p7 }
 0x8d3   :  { %2887 = shalt.err (!%p2884_p9)
}
 0x8d4   :  { %2060 = dma.vmem_to_hbm [thread:$0]  %s2058_s25, 16, %s3503_s9, [#allocation11]  }
 0x8d5   :  { %s2952_s2 = smov [#allocation12]  }
 0x8d6   :  { %s2067_s14 = sshll.u32 %s2952_s2, 4  ;;  %s2068_s14 = int_to_ptr.vmem [resolvable:$true] %s2067_s14 }
 0x8d7   :  { %s2888_s18 = scalar_lea.vmem %s2068_s14, 16  ;;  %s2892_s19 = scalar_lea.vmem %s2068_s14, 32 }
 0x8d8   :  { %p2889_p10 = scmp.ne.s32.totalorder %s2068_s14, %s2888_s18  ;;  %p2893_p11 = scmp.lt.s32.totalorder %s2068_s14, %s2068_s14 }
 0x8d9   :  { %p2894_p12 = scmp.lt.s32.totalorder %s2892_s19, %s2888_s18 }
 0x8db   :  { %p2895_p13 = por %p2894_p12, %p2893_p11 }
 0x8dd   :  { %p2896_p0 = pnand %p2895_p13, %p2889_p10 }
 0x8df   :  { %2899 = shalt.err (!%p2896_p0)
}
 0x8e0   :  { %s2900_s4 = scalar_lea.hbm %s3504_s10, 16 }
 0x8e1   :  { %p2901_p1 = scmp.ne.s32.totalorder %s3504_s10, %s2900_s4  ;;  %p2904_p2 = scmp.lt.u32.totalorder %s2900_s4, %s3504_s10 }
 0x8e3   :  { %p2906_p3 = pnand %p2904_p2, %p2901_p1 }
 0x8e5   :  { %2909 = shalt.err (!%p2906_p3)
}
 0x8e6   :  { %2070 = dma.vmem_to_hbm [thread:$0]  %s2068_s14, 16, %s3504_s10, [#allocation11]   ;;  %v2106_v40 = vld [vmem:[%s3499_s5] ss:$0 sm:$0xff] }
 0x8e7   :  { %s2953_s7 = smov [#allocation9]  }
 0x8e8   :  { %s2047_s25 = sshll.u32 %s2953_s7, 4  ;;  %s2048_s25 = int_to_ptr.vmem [resolvable:$true] %s2047_s25 }
 0x8e9   :  { %s2910_s26 = scalar_lea.vmem %s2048_s25, 128  ;;  %p2915_p5 = scmp.lt.s32.totalorder %s2048_s25, %s2048_s25 }
 0x8ea   :  { %p2911_p4 = scmp.ne.s32.totalorder %s2048_s25, %s2910_s26  ;;  %p2916_p6 = scmp.lt.s32.totalorder %s2910_s26, %s2910_s26 }
 0x8ec   :  { %p2917_p7 = por %p2916_p6, %p2915_p5 }
 0x8ee   :  { %p2918_p8 = pnand %p2917_p7, %p2911_p4 }
 0x99f   :  { %v2034_v45 = vpop.f32.mrb[16].mxu0 }
 0x9a0   :  { %v2035_v46 = vadd.f32 %v2106_v40, %v2034_v45  ;;  %v2158_v50 = vpop.f32.mrb[17].mxu0 }
 0x9a2   :  { %2038 = vst [vmem:[#allocation9] sm:$0xff] %v2035_v46 }
 0x9a3   :  { %2921 = shalt.err (!%p2918_p8)
}
 0x9a4   :  { %s2922_s28 = scalar_lea.hbm %s3502_s8, 128 }
 0x9a5   :  { %p2923_p9 = scmp.ne.s32.totalorder %s3502_s8, %s2922_s28  ;;  %p2926_p10 = scmp.lt.u32.totalorder %s2922_s28, %s3502_s8 }
 0x9a7   :  { %p2928_p11 = pnand %p2926_p10, %p2923_p9 }
 0x9a9   :  { %2931 = shalt.err (!%p2928_p11)
}
 0x9aa   :  { %2050 = dma.vmem_to_hbm [thread:$0]  %s2048_s25, 128, %s3502_s8, [#allocation6]  }
 0x9ab   :  { %2936 = dma.done.wait [#allocation6], 128  }
 0x9ac   :  { %2937 = vsyncadd [#allocation6], 4294967168 }
 0x9ad   :  { %2938 = dma.done.wait [#allocation11], 32  }
 0x9ae   :  { %2939 = vsyncadd [#allocation11], 4294967264 }
 0x9af   :  { %2080 = vsyncpa [#allocation5], 1 }
 0x9b0   :  { %2081 = vsyncpa [#allocation8], 1 }
 0x9b1   :  { %2082 = vsyncpa [#allocation6], 1 }
 0x9b2   :  { %2083 = vsyncpa [#allocation11], 1 }

</bundles_post_ra>
